<compile_context>
chip_gen: v7x
topology: tpu7x:2x2x1
jax: 0.10.0
libtpu: 0.0.40
codegen_flags: <defaults>
</compile_context>

<pallas_src>
import functools

import numpy as np
import jax
import jax.numpy as jnp
from jax import lax
from jax.experimental import pallas as pl
from jax.experimental.pallas import tpu as pltpu


# ---------------------------------------------------------------------------
# Pallas kernel: pool -> conv1(1x1) -> conv2(2x2 on 2x2 map) -> fc
# ---------------------------------------------------------------------------
def aux_head_kernel(x_ref, w1_ref, t1_ref, w2_ref, t2_ref, wfc_ref, bfc_ref,
                    out_ref):
    f32 = jnp.float32
    bf16 = jnp.bfloat16
    tb = out_ref.shape[0]                        # batch rows per block

    x = x_ref[...]                               # (8, 8, tb, C) bf16
    up = lambda v: v.astype(f32)

    # ---- SNN avg-pool 5x5 / stride 3: separable row+col sums (pure VPU) ----
    # The /25 of the mean is dropped because only the sign feeds the spike.
    rh = (up(x[0]) + up(x[1]) + up(x[2]) + up(x[3]) + up(x[4]),   # ph = 0
          up(x[3]) + up(x[4]) + up(x[5]) + up(x[6]) + up(x[7]))   # ph = 1

    mem2 = jnp.zeros((tb, 768), f32)
    for p in range(4):                           # 2x2 pooled positions, p = ph*2+pw
        ph, pw = divmod(p, 2)
        r = rh[ph]                               # (8, tb, C) f32
        pooled = r[3*pw] + r[3*pw+1] + r[3*pw+2] + r[3*pw+3] + r[3*pw+4]
        spike0 = (pooled > 0.0).astype(bf16)     # (tb, C), exact 0/1

        # conv1: 1x1 conv (C -> 128); BN scale folded into w1, bias into thresh.
        z1 = jnp.dot(spike0, w1_ref[...], preferred_element_type=f32)  # (tb,128)
        spike1 = (z1 > t1_ref[...]).astype(bf16)

        # conv2: 2x2 conv on the 2x2 map == sum over p of K=128 matmuls.
        mem2 = mem2 + jnp.dot(spike1, w2_ref[p], preferred_element_type=f32)

    spike2 = (mem2 > t2_ref[...]).astype(bf16)   # (tb, 768)

    # ---- classifier: Linear(768, nc), lane-padded to 128 (dense stores) -----
    out_ref[...] = (jnp.dot(spike2, wfc_ref[...], preferred_element_type=f32)
                    + bfc_ref[...])


# ---------------------------------------------------------------------------
# Batch-tile selection: big M for the MXU, bounded VMEM, >= 2 grid steps when
# the batch allows (both v7x TensorCores), multiple of 16 (bf16 sublane tile).
# ---------------------------------------------------------------------------
def _pick_block_b(N, C):
    r16 = lambda v: max(16, ((v + 15) // 16) * 16)
    # keep the double-buffered bf16 x block (2 * 64*tb*C*2 bytes) <= ~16 MiB
    cap = max(16, (((16 << 20) // (256 * max(C, 1))) // 16) * 16)
    tb = min(256, cap, r16(N))
    if N > 16:
        tb = min(tb, r16((N + 1) // 2))
    return tb


# ---------------------------------------------------------------------------
# Wrapper
# ---------------------------------------------------------------------------
@functools.partial(jax.jit, static_argnames=("block_b",))
def auxiliary_head_cifar(x_nchw, w1, bn1_scale, bn1_bias,
                         w2, bn2_scale, bn2_bias, wfc, bfc, *, block_b=None):
    N, C, H, W = x_nchw.shape
    assert (H, W) == (8, 8), "AuxiliaryHeadCIFAR assumes 8x8 input"
    num_classes = wfc.shape[-1]
    nc_pad = max(128, ((num_classes + 127) // 128) * 128)   # lane-dense output

    tb = _pick_block_b(N, C) if block_b is None else block_b
    assert tb % 16 == 0, "batch block must be a multiple of 16"
    n_pad = ((N + tb - 1) // tb) * tb

    # NCHW -> (H, W, N, C) bf16: spatial in leading dims (static in-kernel
    # indexing for the pool), batch in sublanes, channels in lanes.  Only this
    # tensor streams per grid step.
    x = jnp.transpose(x_nchw, (2, 3, 0, 1)).astype(jnp.bfloat16)
    if n_pad != N:
        x = jnp.pad(x, ((0, 0), (0, 0), (0, n_pad - N), (0, 0)))

    # BN fold: z*s + b > 0  <=>  z @ (w*s) > -b.  Spikes are exact 0/1 so bf16
    # only rounds the (folded) weights; accumulation stays f32 in the kernel.
    w1s = (w1 * bn1_scale.reshape(1, -1)).astype(jnp.bfloat16)       # (C, 128)
    t1 = (-bn1_bias).reshape(1, -1).astype(jnp.float32)              # (1, 128)
    w2s = (w2 * bn2_scale.reshape(1, 1, -1)).astype(jnp.bfloat16)    # (4, 128, 768)
    t2 = (-bn2_bias).reshape(1, -1).astype(jnp.float32)              # (1, 768)
    wfc_b = jnp.pad(wfc.astype(jnp.bfloat16),
                    ((0, 0), (0, nc_pad - num_classes)))             # (768, nc_pad)
    bfc_p = jnp.pad(bfc.reshape(1, -1).astype(jnp.float32),
                    ((0, 0), (0, nc_pad - num_classes)))             # (1, nc_pad)

    def resident(shape):                       # VMEM-resident, DMA'd once
        nd = len(shape)
        return pl.BlockSpec(shape, lambda i, _nd=nd: (0,) * _nd)

    flops = int(2 * n_pad * (4 * C * 128 + 4 * 128 * 768 + 768 * nc_pad)
                + 2 * n_pad * 64 * C)
    bytes_accessed = int(64 * n_pad * C * 2
                         + (C * 128 + 4 * 128 * 768 + 768 * nc_pad) * 2
                         + (128 + 768 + nc_pad) * 4
                         + n_pad * nc_pad * 4)

    out = pl.pallas_call(
        aux_head_kernel,
        out_shape=jax.ShapeDtypeStruct((n_pad, nc_pad), jnp.float32),
        grid=(n_pad // tb,),
        in_specs=[
            pl.BlockSpec((8, 8, tb, C), lambda i: (0, 0, i, 0)),  # x (streamed)
            resident((C, 128)),          # w1 * bn1_scale
            resident((1, 128)),          # threshold1 = -bn1_bias
            resident((4, 128, 768)),     # w2 * bn2_scale
            resident((1, 768)),          # threshold2 = -bn2_bias
            resident((768, nc_pad)),     # wfc (lane-padded)
            resident((1, nc_pad)),       # bfc (lane-padded)
        ],
        out_specs=pl.BlockSpec((tb, nc_pad), lambda i: (i, 0)),
        compiler_params=pltpu.CompilerParams(
            dimension_semantics=("parallel",),       # megacore / 2 TCs on v7x
            vmem_limit_bytes=48 * 1024 * 1024),
        cost_estimate=pl.CostEstimate(flops=flops, transcendentals=0,
                                      bytes_accessed=bytes_accessed),
    )(x, w1s, t1, w2s, t2, wfc_b, bfc_p)

    return out[:N, :num_classes]


# ---------------------------------------------------------------------------
# Pure-JAX reference (conventional pooling / conv / fc formulation).
# It consumes the same effective (scale-folded, bf16-rounded) weights and
# thresholds the kernel uses so spike decisions compare on identical numbers;
# accumulation is f32 everywhere.
# ---------------------------------------------------------------------------
def reference_forward(x_nchw, w1_eff, t1, w2_eff, t2, wfc_eff, bfc):
    hi = lax.Precision.HIGHEST
    x = jnp.transpose(x_nchw, (0, 2, 3, 1))
    x = x.astype(jnp.bfloat16).astype(jnp.float32)      # kernel streams bf16 x
    rows = []
    for ph in range(2):
        cols = []
        for pw in range(2):
            win = x[:, 3 * ph:3 * ph + 5, 3 * pw:3 * pw + 5, :]
            cols.append(jnp.mean(win, axis=(1, 2)))
        rows.append(jnp.stack(cols, axis=1))
    pooled = jnp.stack(rows, axis=1)                    # (N, 2, 2, C)
    spike0 = (pooled > 0.0).astype(jnp.float32)

    mem1 = jnp.einsum('nhwc,ck->nhwk', spike0, w1_eff, precision=hi)
    spike1 = (mem1 > t1.reshape(1, 1, 1, -1)).astype(jnp.float32)   # (N,2,2,128)

    w2r = w2_eff.reshape(2, 2, 128, 768)                # (kh, kw, ci, co)
    mem2 = jnp.einsum('nhwc,hwck->nk', spike1, w2r, precision=hi)
    spike2 = (mem2 > t2.reshape(1, -1)).astype(jnp.float32)         # (N, 768)

    return jnp.dot(spike2, wfc_eff, precision=hi) + bfc.reshape(1, -1)


if __name__ == "__main__":
    N, C, H, W = 2, 4, 8, 8
    NUM_CLASSES = 10

    key = jax.random.PRNGKey(0)
    ks = jax.random.split(key, 16)

    x = jax.random.normal(ks[0], (N, C, H, W), jnp.float32)

    # conv1: PyTorch weight (128, C, 1, 1) stored transposed as (C, 128)
    w1 = jax.random.normal(ks[1], (C, 128), jnp.float32) / np.sqrt(C)
    g1 = 1.0 + 0.1 * jax.random.normal(ks[2], (128,), jnp.float32)
    b1 = 0.1 * jax.random.normal(ks[3], (128,), jnp.float32)
    m1 = 0.1 * jax.random.normal(ks[4], (128,), jnp.float32)
    v1 = 1.0 + 0.1 * jnp.abs(jax.random.normal(ks[5], (128,), jnp.float32))
    bn1_scale = g1 / jnp.sqrt(v1 + 1e-5)
    bn1_bias = b1 - m1 * g1 / jnp.sqrt(v1 + 1e-5)

    # conv2: PyTorch weight (768, 128, 2, 2) stored as (kh*kw, ci, co) = (4, 128, 768)
    w2 = jax.random.normal(ks[6], (4, 128, 768), jnp.float32) / np.sqrt(4 * 128)
    g2 = 1.0 + 0.1 * jax.random.normal(ks[7], (768,), jnp.float32)
    b2 = 0.1 * jax.random.normal(ks[8], (768,), jnp.float32)
    m2 = 0.1 * jax.random.normal(ks[9], (768,), jnp.float32)
    v2 = 1.0 + 0.1 * jnp.abs(jax.random.normal(ks[10], (768,), jnp.float32))
    bn2_scale = g2 / jnp.sqrt(v2 + 1e-5)
    bn2_bias = b2 - m2 * g2 / jnp.sqrt(v2 + 1e-5)

    # classifier: PyTorch Linear(768, num_classes) stored transposed as (768, nc)
    wfc = 0.02 * jax.random.normal(ks[11], (768, NUM_CLASSES), jnp.float32)
    bfc = 0.01 * jax.random.normal(ks[12], (1, NUM_CLASSES), jnp.float32)

    out = auxiliary_head_cifar(x, w1, bn1_scale, bn1_bias,
                               w2, bn2_scale, bn2_bias, wfc, bfc)
    out = jax.block_until_ready(out)

    # Reference uses the same effective (scale-folded, bf16-rounded) weights
    # the kernel consumes, so spike thresholds compare on identical numbers.
    w1_eff = (w1 * bn1_scale.reshape(1, -1)).astype(jnp.bfloat16).astype(jnp.float32)
    w2_eff = (w2 * bn2_scale.reshape(1, 1, -1)).astype(jnp.bfloat16).astype(jnp.float32)
    wfc_eff = wfc.astype(jnp.bfloat16).astype(jnp.float32)
    ref = reference_forward(x, w1_eff, -bn1_bias, w2_eff, -bn2_bias, wfc_eff, bfc)
    ref = jax.block_until_ready(ref)

    assert out.shape == (N, NUM_CLASSES)
    np.testing.assert_allclose(np.asarray(out), np.asarray(ref),
                               rtol=1e-3, atol=5e-2)
    print("KERNEL_OK")
</pallas_src>

<mosaic_0001>
module attributes {stable_mosaic.version = 11 : i64} {
  func.func @aux_head_kernel(%arg0: i32, %arg1: memref<8x8x16x4xbf16, #tpu.memory_space<vmem>>, %arg2: memref<4x128xbf16, #tpu.memory_space<vmem>>, %arg3: memref<1x128xf32, #tpu.memory_space<vmem>>, %arg4: memref<4x128x768xbf16, #tpu.memory_space<vmem>>, %arg5: memref<1x768xf32, #tpu.memory_space<vmem>>, %arg6: memref<768x128xbf16, #tpu.memory_space<vmem>>, %arg7: memref<1x128xf32, #tpu.memory_space<vmem>>, %arg8: memref<16x128xf32, #tpu.memory_space<vmem>>) attributes {dimension_semantics = [#tpu.dimension_semantics<parallel>], iteration_bounds = array<i64: 1>, scalar_prefetch = 0 : i64, scratch_operands = 0 : i64, tpu.core_type = #tpu.core_type<tc>, window_params = [{transform_indices = @transform_0, window_bounds = array<i64: 8, 8, 16, 4>}, {pipeline_mode = #tpu.pipeline_mode<synchronous>, transform_indices = @transform_1, window_bounds = array<i64: 4, 128>}, {pipeline_mode = #tpu.pipeline_mode<synchronous>, transform_indices = @transform_2, window_bounds = array<i64: 1, 128>}, {pipeline_mode = #tpu.pipeline_mode<synchronous>, transform_indices = @transform_3, window_bounds = array<i64: 4, 128, 768>}, {pipeline_mode = #tpu.pipeline_mode<synchronous>, transform_indices = @transform_4, window_bounds = array<i64: 1, 768>}, {pipeline_mode = #tpu.pipeline_mode<synchronous>, transform_indices = @transform_5, window_bounds = array<i64: 768, 128>}, {pipeline_mode = #tpu.pipeline_mode<synchronous>, transform_indices = @transform_6, window_bounds = array<i64: 1, 128>}, {transform_indices = @transform_7, window_bounds = array<i64: 16, 128>}]} {
    %c0 = arith.constant 0 : index
    %c0_0 = arith.constant 0 : index
    %c0_1 = arith.constant 0 : index
    %c0_2 = arith.constant 0 : index
    %0 = vector.load %arg1[%c0, %c0_0, %c0_1, %c0_2] : memref<8x8x16x4xbf16, #tpu.memory_space<vmem>>, vector<8x8x16x4xbf16>
    %1 = vector.extract_strided_slice %0 {offsets = [0, 0, 0, 0], sizes = [1, 8, 16, 4], strides = [1, 1, 1, 1]} : vector<8x8x16x4xbf16> to vector<1x8x16x4xbf16>
    %2 = vector.shape_cast %1 : vector<1x8x16x4xbf16> to vector<8x16x4xbf16>
    %3 = arith.extf %2 : vector<8x16x4xbf16> to vector<8x16x4xf32>
    %4 = vector.extract_strided_slice %0 {offsets = [1, 0, 0, 0], sizes = [1, 8, 16, 4], strides = [1, 1, 1, 1]} : vector<8x8x16x4xbf16> to vector<1x8x16x4xbf16>
    %5 = vector.shape_cast %4 : vector<1x8x16x4xbf16> to vector<8x16x4xbf16>
    %6 = arith.extf %5 : vector<8x16x4xbf16> to vector<8x16x4xf32>
    %7 = arith.addf %3, %6 : vector<8x16x4xf32>
    %8 = vector.extract_strided_slice %0 {offsets = [2, 0, 0, 0], sizes = [1, 8, 16, 4], strides = [1, 1, 1, 1]} : vector<8x8x16x4xbf16> to vector<1x8x16x4xbf16>
    %9 = vector.shape_cast %8 : vector<1x8x16x4xbf16> to vector<8x16x4xbf16>
    %10 = arith.extf %9 : vector<8x16x4xbf16> to vector<8x16x4xf32>
    %11 = arith.addf %7, %10 : vector<8x16x4xf32>
    %12 = vector.extract_strided_slice %0 {offsets = [3, 0, 0, 0], sizes = [1, 8, 16, 4], strides = [1, 1, 1, 1]} : vector<8x8x16x4xbf16> to vector<1x8x16x4xbf16>
    %13 = vector.shape_cast %12 : vector<1x8x16x4xbf16> to vector<8x16x4xbf16>
    %14 = arith.extf %13 : vector<8x16x4xbf16> to vector<8x16x4xf32>
    %15 = arith.addf %11, %14 : vector<8x16x4xf32>
    %16 = vector.extract_strided_slice %0 {offsets = [4, 0, 0, 0], sizes = [1, 8, 16, 4], strides = [1, 1, 1, 1]} : vector<8x8x16x4xbf16> to vector<1x8x16x4xbf16>
    %17 = vector.shape_cast %16 : vector<1x8x16x4xbf16> to vector<8x16x4xbf16>
    %18 = arith.extf %17 : vector<8x16x4xbf16> to vector<8x16x4xf32>
    %19 = arith.addf %15, %18 : vector<8x16x4xf32>
    %20 = vector.extract_strided_slice %0 {offsets = [3, 0, 0, 0], sizes = [1, 8, 16, 4], strides = [1, 1, 1, 1]} : vector<8x8x16x4xbf16> to vector<1x8x16x4xbf16>
    %21 = vector.shape_cast %20 : vector<1x8x16x4xbf16> to vector<8x16x4xbf16>
    %22 = arith.extf %21 : vector<8x16x4xbf16> to vector<8x16x4xf32>
    %23 = vector.extract_strided_slice %0 {offsets = [4, 0, 0, 0], sizes = [1, 8, 16, 4], strides = [1, 1, 1, 1]} : vector<8x8x16x4xbf16> to vector<1x8x16x4xbf16>
    %24 = vector.shape_cast %23 : vector<1x8x16x4xbf16> to vector<8x16x4xbf16>
    %25 = arith.extf %24 : vector<8x16x4xbf16> to vector<8x16x4xf32>
    %26 = arith.addf %22, %25 : vector<8x16x4xf32>
    %27 = vector.extract_strided_slice %0 {offsets = [5, 0, 0, 0], sizes = [1, 8, 16, 4], strides = [1, 1, 1, 1]} : vector<8x8x16x4xbf16> to vector<1x8x16x4xbf16>
    %28 = vector.shape_cast %27 : vector<1x8x16x4xbf16> to vector<8x16x4xbf16>
    %29 = arith.extf %28 : vector<8x16x4xbf16> to vector<8x16x4xf32>
    %30 = arith.addf %26, %29 : vector<8x16x4xf32>
    %31 = vector.extract_strided_slice %0 {offsets = [6, 0, 0, 0], sizes = [1, 8, 16, 4], strides = [1, 1, 1, 1]} : vector<8x8x16x4xbf16> to vector<1x8x16x4xbf16>
    %32 = vector.shape_cast %31 : vector<1x8x16x4xbf16> to vector<8x16x4xbf16>
    %33 = arith.extf %32 : vector<8x16x4xbf16> to vector<8x16x4xf32>
    %34 = arith.addf %30, %33 : vector<8x16x4xf32>
    %35 = vector.extract_strided_slice %0 {offsets = [7, 0, 0, 0], sizes = [1, 8, 16, 4], strides = [1, 1, 1, 1]} : vector<8x8x16x4xbf16> to vector<1x8x16x4xbf16>
    %36 = vector.shape_cast %35 : vector<1x8x16x4xbf16> to vector<8x16x4xbf16>
    %37 = arith.extf %36 : vector<8x16x4xbf16> to vector<8x16x4xf32>
    %38 = arith.addf %34, %37 : vector<8x16x4xf32>
    %cst = arith.constant 0.000000e+00 : f32
    %39 = vector.broadcast %cst : f32 to vector<16x768xf32>
    %40 = vector.extract_strided_slice %19 {offsets = [0, 0, 0], sizes = [1, 16, 4], strides = [1, 1, 1]} : vector<8x16x4xf32> to vector<1x16x4xf32>
    %41 = vector.shape_cast %40 : vector<1x16x4xf32> to vector<16x4xf32>
    %42 = vector.extract_strided_slice %19 {offsets = [1, 0, 0], sizes = [1, 16, 4], strides = [1, 1, 1]} : vector<8x16x4xf32> to vector<1x16x4xf32>
    %43 = vector.shape_cast %42 : vector<1x16x4xf32> to vector<16x4xf32>
    %44 = arith.addf %41, %43 : vector<16x4xf32>
    %45 = vector.extract_strided_slice %19 {offsets = [2, 0, 0], sizes = [1, 16, 4], strides = [1, 1, 1]} : vector<8x16x4xf32> to vector<1x16x4xf32>
    %46 = vector.shape_cast %45 : vector<1x16x4xf32> to vector<16x4xf32>
    %47 = arith.addf %44, %46 : vector<16x4xf32>
    %48 = vector.extract_strided_slice %19 {offsets = [3, 0, 0], sizes = [1, 16, 4], strides = [1, 1, 1]} : vector<8x16x4xf32> to vector<1x16x4xf32>
    %49 = vector.shape_cast %48 : vector<1x16x4xf32> to vector<16x4xf32>
    %50 = arith.addf %47, %49 : vector<16x4xf32>
    %51 = vector.extract_strided_slice %19 {offsets = [4, 0, 0], sizes = [1, 16, 4], strides = [1, 1, 1]} : vector<8x16x4xf32> to vector<1x16x4xf32>
    %52 = vector.shape_cast %51 : vector<1x16x4xf32> to vector<16x4xf32>
    %53 = arith.addf %50, %52 : vector<16x4xf32>
    %cst_3 = arith.constant 0.000000e+00 : f32
    %54 = vector.broadcast %cst_3 : f32 to vector<16x4xf32>
    %55 = arith.cmpf ogt, %53, %54 : vector<16x4xf32>
    %56 = arith.extui %55 : vector<16x4xi1> to vector<16x4xi32>
    %57 = arith.sitofp %56 : vector<16x4xi32> to vector<16x4xf32>
    %58 = arith.truncf %57 : vector<16x4xf32> to vector<16x4xbf16>
    %c0_4 = arith.constant 0 : index
    %c0_5 = arith.constant 0 : index
    %59 = vector.load %arg2[%c0_4, %c0_5] : memref<4x128xbf16, #tpu.memory_space<vmem>>, vector<4x128xbf16>
    %cst_6 = arith.constant dense<0.000000e+00> : vector<16x128xf32>
    %60 = tpu.matmul %58, %59, %cst_6 {dimension_numbers = #tpu.dot_dimension_numbers<[1], [0], [0], [1], [0, 0, 1, 1], [], []>} : vector<16x4xbf16>, vector<4x128xbf16>, vector<16x128xf32> -> vector<16x128xf32>
    %c0_7 = arith.constant 0 : index
    %c0_8 = arith.constant 0 : index
    %61 = vector.load %arg3[%c0_7, %c0_8] : memref<1x128xf32, #tpu.memory_space<vmem>>, vector<1x128xf32>
    %62 = vector.broadcast %61 : vector<1x128xf32> to vector<16x128xf32>
    %63 = arith.cmpf ogt, %60, %62 : vector<16x128xf32>
    %64 = arith.extui %63 : vector<16x128xi1> to vector<16x128xi32>
    %65 = arith.sitofp %64 : vector<16x128xi32> to vector<16x128xf32>
    %66 = arith.truncf %65 : vector<16x128xf32> to vector<16x128xbf16>
    %c0_9 = arith.constant 0 : index
    %c0_10 = arith.constant 0 : index
    %c0_11 = arith.constant 0 : index
    %67 = vector.load %arg4[%c0_9, %c0_10, %c0_11] : memref<4x128x768xbf16, #tpu.memory_space<vmem>>, vector<1x128x768xbf16>
    %68 = vector.shape_cast %67 : vector<1x128x768xbf16> to vector<128x768xbf16>
    %cst_12 = arith.constant dense<0.000000e+00> : vector<16x768xf32>
    %69 = tpu.matmul %66, %68, %cst_12 {dimension_numbers = #tpu.dot_dimension_numbers<[1], [0], [0], [1], [0, 0, 1, 1], [], []>} : vector<16x128xbf16>, vector<128x768xbf16>, vector<16x768xf32> -> vector<16x768xf32>
    %70 = arith.addf %39, %69 : vector<16x768xf32>
    %71 = vector.extract_strided_slice %19 {offsets = [3, 0, 0], sizes = [1, 16, 4], strides = [1, 1, 1]} : vector<8x16x4xf32> to vector<1x16x4xf32>
    %72 = vector.shape_cast %71 : vector<1x16x4xf32> to vector<16x4xf32>
    %73 = vector.extract_strided_slice %19 {offsets = [4, 0, 0], sizes = [1, 16, 4], strides = [1, 1, 1]} : vector<8x16x4xf32> to vector<1x16x4xf32>
    %74 = vector.shape_cast %73 : vector<1x16x4xf32> to vector<16x4xf32>
    %75 = arith.addf %72, %74 : vector<16x4xf32>
    %76 = vector.extract_strided_slice %19 {offsets = [5, 0, 0], sizes = [1, 16, 4], strides = [1, 1, 1]} : vector<8x16x4xf32> to vector<1x16x4xf32>
    %77 = vector.shape_cast %76 : vector<1x16x4xf32> to vector<16x4xf32>
    %78 = arith.addf %75, %77 : vector<16x4xf32>
    %79 = vector.extract_strided_slice %19 {offsets = [6, 0, 0], sizes = [1, 16, 4], strides = [1, 1, 1]} : vector<8x16x4xf32> to vector<1x16x4xf32>
    %80 = vector.shape_cast %79 : vector<1x16x4xf32> to vector<16x4xf32>
    %81 = arith.addf %78, %80 : vector<16x4xf32>
    %82 = vector.extract_strided_slice %19 {offsets = [7, 0, 0], sizes = [1, 16, 4], strides = [1, 1, 1]} : vector<8x16x4xf32> to vector<1x16x4xf32>
    %83 = vector.shape_cast %82 : vector<1x16x4xf32> to vector<16x4xf32>
    %84 = arith.addf %81, %83 : vector<16x4xf32>
    %cst_13 = arith.constant 0.000000e+00 : f32
    %85 = vector.broadcast %cst_13 : f32 to vector<16x4xf32>
    %86 = arith.cmpf ogt, %84, %85 : vector<16x4xf32>
    %87 = arith.extui %86 : vector<16x4xi1> to vector<16x4xi32>
    %88 = arith.sitofp %87 : vector<16x4xi32> to vector<16x4xf32>
    %89 = arith.truncf %88 : vector<16x4xf32> to vector<16x4xbf16>
    %c0_14 = arith.constant 0 : index
    %c0_15 = arith.constant 0 : index
    %90 = vector.load %arg2[%c0_14, %c0_15] : memref<4x128xbf16, #tpu.memory_space<vmem>>, vector<4x128xbf16>
    %cst_16 = arith.constant dense<0.000000e+00> : vector<16x128xf32>
    %91 = tpu.matmul %89, %90, %cst_16 {dimension_numbers = #tpu.dot_dimension_numbers<[1], [0], [0], [1], [0, 0, 1, 1], [], []>} : vector<16x4xbf16>, vector<4x128xbf16>, vector<16x128xf32> -> vector<16x128xf32>
    %c0_17 = arith.constant 0 : index
    %c0_18 = arith.constant 0 : index
    %92 = vector.load %arg3[%c0_17, %c0_18] : memref<1x128xf32, #tpu.memory_space<vmem>>, vector<1x128xf32>
    %93 = vector.broadcast %92 : vector<1x128xf32> to vector<16x128xf32>
    %94 = arith.cmpf ogt, %91, %93 : vector<16x128xf32>
    %95 = arith.extui %94 : vector<16x128xi1> to vector<16x128xi32>
    %96 = arith.sitofp %95 : vector<16x128xi32> to vector<16x128xf32>
    %97 = arith.truncf %96 : vector<16x128xf32> to vector<16x128xbf16>
    %c1 = arith.constant 1 : index
    %c0_19 = arith.constant 0 : index
    %c0_20 = arith.constant 0 : index
    %98 = vector.load %arg4[%c1, %c0_19, %c0_20] : memref<4x128x768xbf16, #tpu.memory_space<vmem>>, vector<1x128x768xbf16>
    %99 = vector.shape_cast %98 : vector<1x128x768xbf16> to vector<128x768xbf16>
    %cst_21 = arith.constant dense<0.000000e+00> : vector<16x768xf32>
    %100 = tpu.matmul %97, %99, %cst_21 {dimension_numbers = #tpu.dot_dimension_numbers<[1], [0], [0], [1], [0, 0, 1, 1], [], []>} : vector<16x128xbf16>, vector<128x768xbf16>, vector<16x768xf32> -> vector<16x768xf32>
    %101 = arith.addf %70, %100 : vector<16x768xf32>
    %102 = vector.extract_strided_slice %38 {offsets = [0, 0, 0], sizes = [1, 16, 4], strides = [1, 1, 1]} : vector<8x16x4xf32> to vector<1x16x4xf32>
    %103 = vector.shape_cast %102 : vector<1x16x4xf32> to vector<16x4xf32>
    %104 = vector.extract_strided_slice %38 {offsets = [1, 0, 0], sizes = [1, 16, 4], strides = [1, 1, 1]} : vector<8x16x4xf32> to vector<1x16x4xf32>
    %105 = vector.shape_cast %104 : vector<1x16x4xf32> to vector<16x4xf32>
    %106 = arith.addf %103, %105 : vector<16x4xf32>
    %107 = vector.extract_strided_slice %38 {offsets = [2, 0, 0], sizes = [1, 16, 4], strides = [1, 1, 1]} : vector<8x16x4xf32> to vector<1x16x4xf32>
    %108 = vector.shape_cast %107 : vector<1x16x4xf32> to vector<16x4xf32>
    %109 = arith.addf %106, %108 : vector<16x4xf32>
    %110 = vector.extract_strided_slice %38 {offsets = [3, 0, 0], sizes = [1, 16, 4], strides = [1, 1, 1]} : vector<8x16x4xf32> to vector<1x16x4xf32>
    %111 = vector.shape_cast %110 : vector<1x16x4xf32> to vector<16x4xf32>
    %112 = arith.addf %109, %111 : vector<16x4xf32>
    %113 = vector.extract_strided_slice %38 {offsets = [4, 0, 0], sizes = [1, 16, 4], strides = [1, 1, 1]} : vector<8x16x4xf32> to vector<1x16x4xf32>
    %114 = vector.shape_cast %113 : vector<1x16x4xf32> to vector<16x4xf32>
    %115 = arith.addf %112, %114 : vector<16x4xf32>
    %cst_22 = arith.constant 0.000000e+00 : f32
    %116 = vector.broadcast %cst_22 : f32 to vector<16x4xf32>
    %117 = arith.cmpf ogt, %115, %116 : vector<16x4xf32>
    %118 = arith.extui %117 : vector<16x4xi1> to vector<16x4xi32>
    %119 = arith.sitofp %118 : vector<16x4xi32> to vector<16x4xf32>
    %120 = arith.truncf %119 : vector<16x4xf32> to vector<16x4xbf16>
    %c0_23 = arith.constant 0 : index
    %c0_24 = arith.constant 0 : index
    %121 = vector.load %arg2[%c0_23, %c0_24] : memref<4x128xbf16, #tpu.memory_space<vmem>>, vector<4x128xbf16>
    %cst_25 = arith.constant dense<0.000000e+00> : vector<16x128xf32>
    %122 = tpu.matmul %120, %121, %cst_25 {dimension_numbers = #tpu.dot_dimension_numbers<[1], [0], [0], [1], [0, 0, 1, 1], [], []>} : vector<16x4xbf16>, vector<4x128xbf16>, vector<16x128xf32> -> vector<16x128xf32>
    %c0_26 = arith.constant 0 : index
    %c0_27 = arith.constant 0 : index
    %123 = vector.load %arg3[%c0_26, %c0_27] : memref<1x128xf32, #tpu.memory_space<vmem>>, vector<1x128xf32>
    %124 = vector.broadcast %123 : vector<1x128xf32> to vector<16x128xf32>
    %125 = arith.cmpf ogt, %122, %124 : vector<16x128xf32>
    %126 = arith.extui %125 : vector<16x128xi1> to vector<16x128xi32>
    %127 = arith.sitofp %126 : vector<16x128xi32> to vector<16x128xf32>
    %128 = arith.truncf %127 : vector<16x128xf32> to vector<16x128xbf16>
    %c2 = arith.constant 2 : index
    %c0_28 = arith.constant 0 : index
    %c0_29 = arith.constant 0 : index
    %129 = vector.load %arg4[%c2, %c0_28, %c0_29] : memref<4x128x768xbf16, #tpu.memory_space<vmem>>, vector<1x128x768xbf16>
    %130 = vector.shape_cast %129 : vector<1x128x768xbf16> to vector<128x768xbf16>
    %cst_30 = arith.constant dense<0.000000e+00> : vector<16x768xf32>
    %131 = tpu.matmul %128, %130, %cst_30 {dimension_numbers = #tpu.dot_dimension_numbers<[1], [0], [0], [1], [0, 0, 1, 1], [], []>} : vector<16x128xbf16>, vector<128x768xbf16>, vector<16x768xf32> -> vector<16x768xf32>
    %132 = arith.addf %101, %131 : vector<16x768xf32>
    %133 = vector.extract_strided_slice %38 {offsets = [3, 0, 0], sizes = [1, 16, 4], strides = [1, 1, 1]} : vector<8x16x4xf32> to vector<1x16x4xf32>
    %134 = vector.shape_cast %133 : vector<1x16x4xf32> to vector<16x4xf32>
    %135 = vector.extract_strided_slice %38 {offsets = [4, 0, 0], sizes = [1, 16, 4], strides = [1, 1, 1]} : vector<8x16x4xf32> to vector<1x16x4xf32>
    %136 = vector.shape_cast %135 : vector<1x16x4xf32> to vector<16x4xf32>
    %137 = arith.addf %134, %136 : vector<16x4xf32>
    %138 = vector.extract_strided_slice %38 {offsets = [5, 0, 0], sizes = [1, 16, 4], strides = [1, 1, 1]} : vector<8x16x4xf32> to vector<1x16x4xf32>
    %139 = vector.shape_cast %138 : vector<1x16x4xf32> to vector<16x4xf32>
    %140 = arith.addf %137, %139 : vector<16x4xf32>
    %141 = vector.extract_strided_slice %38 {offsets = [6, 0, 0], sizes = [1, 16, 4], strides = [1, 1, 1]} : vector<8x16x4xf32> to vector<1x16x4xf32>
    %142 = vector.shape_cast %141 : vector<1x16x4xf32> to vector<16x4xf32>
    %143 = arith.addf %140, %142 : vector<16x4xf32>
    %144 = vector.extract_strided_slice %38 {offsets = [7, 0, 0], sizes = [1, 16, 4], strides = [1, 1, 1]} : vector<8x16x4xf32> to vector<1x16x4xf32>
    %145 = vector.shape_cast %144 : vector<1x16x4xf32> to vector<16x4xf32>
    %146 = arith.addf %143, %145 : vector<16x4xf32>
    %cst_31 = arith.constant 0.000000e+00 : f32
    %147 = vector.broadcast %cst_31 : f32 to vector<16x4xf32>
    %148 = arith.cmpf ogt, %146, %147 : vector<16x4xf32>
    %149 = arith.extui %148 : vector<16x4xi1> to vector<16x4xi32>
    %150 = arith.sitofp %149 : vector<16x4xi32> to vector<16x4xf32>
    %151 = arith.truncf %150 : vector<16x4xf32> to vector<16x4xbf16>
    %c0_32 = arith.constant 0 : index
    %c0_33 = arith.constant 0 : index
    %152 = vector.load %arg2[%c0_32, %c0_33] : memref<4x128xbf16, #tpu.memory_space<vmem>>, vector<4x128xbf16>
    %cst_34 = arith.constant dense<0.000000e+00> : vector<16x128xf32>
    %153 = tpu.matmul %151, %152, %cst_34 {dimension_numbers = #tpu.dot_dimension_numbers<[1], [0], [0], [1], [0, 0, 1, 1], [], []>} : vector<16x4xbf16>, vector<4x128xbf16>, vector<16x128xf32> -> vector<16x128xf32>
    %c0_35 = arith.constant 0 : index
    %c0_36 = arith.constant 0 : index
    %154 = vector.load %arg3[%c0_35, %c0_36] : memref<1x128xf32, #tpu.memory_space<vmem>>, vector<1x128xf32>
    %155 = vector.broadcast %154 : vector<1x128xf32> to vector<16x128xf32>
    %156 = arith.cmpf ogt, %153, %155 : vector<16x128xf32>
    %157 = arith.extui %156 : vector<16x128xi1> to vector<16x128xi32>
    %158 = arith.sitofp %157 : vector<16x128xi32> to vector<16x128xf32>
    %159 = arith.truncf %158 : vector<16x128xf32> to vector<16x128xbf16>
    %c3 = arith.constant 3 : index
    %c0_37 = arith.constant 0 : index
    %c0_38 = arith.constant 0 : index
    %160 = vector.load %arg4[%c3, %c0_37, %c0_38] : memref<4x128x768xbf16, #tpu.memory_space<vmem>>, vector<1x128x768xbf16>
    %161 = vector.shape_cast %160 : vector<1x128x768xbf16> to vector<128x768xbf16>
    %cst_39 = arith.constant dense<0.000000e+00> : vector<16x768xf32>
    %162 = tpu.matmul %159, %161, %cst_39 {dimension_numbers = #tpu.dot_dimension_numbers<[1], [0], [0], [1], [0, 0, 1, 1], [], []>} : vector<16x128xbf16>, vector<128x768xbf16>, vector<16x768xf32> -> vector<16x768xf32>
    %163 = arith.addf %132, %162 : vector<16x768xf32>
    %c0_40 = arith.constant 0 : index
    %c0_41 = arith.constant 0 : index
    %164 = vector.load %arg5[%c0_40, %c0_41] : memref<1x768xf32, #tpu.memory_space<vmem>>, vector<1x768xf32>
    %165 = vector.broadcast %164 : vector<1x768xf32> to vector<16x768xf32>
    %166 = arith.cmpf ogt, %163, %165 : vector<16x768xf32>
    %167 = arith.extui %166 : vector<16x768xi1> to vector<16x768xi32>
    %168 = arith.sitofp %167 : vector<16x768xi32> to vector<16x768xf32>
    %169 = arith.truncf %168 : vector<16x768xf32> to vector<16x768xbf16>
    %c0_42 = arith.constant 0 : index
    %c0_43 = arith.constant 0 : index
    %170 = vector.load %arg6[%c0_42, %c0_43] : memref<768x128xbf16, #tpu.memory_space<vmem>>, vector<768x128xbf16>
    %cst_44 = arith.constant dense<0.000000e+00> : vector<16x128xf32>
    %171 = tpu.matmul %169, %170, %cst_44 {dimension_numbers = #tpu.dot_dimension_numbers<[1], [0], [0], [1], [0, 0, 1, 1], [], []>} : vector<16x768xbf16>, vector<768x128xbf16>, vector<16x128xf32> -> vector<16x128xf32>
    %c0_45 = arith.constant 0 : index
    %c0_46 = arith.constant 0 : index
    %172 = vector.load %arg7[%c0_45, %c0_46] : memref<1x128xf32, #tpu.memory_space<vmem>>, vector<1x128xf32>
    %173 = vector.broadcast %172 : vector<1x128xf32> to vector<16x128xf32>
    %174 = arith.addf %171, %173 : vector<16x128xf32>
    %c0_47 = arith.constant 0 : index
    %c0_48 = arith.constant 0 : index
    %175 = vector.load %arg8[%c0_47, %c0_48] : memref<16x128xf32, #tpu.memory_space<vmem>>, vector<16x128xf32>
    tpu.vector_store %arg8[%c0_47, %c0_48], %174 {strides = array<i32>} : memref<16x128xf32, #tpu.memory_space<vmem>>, vector<16x128xf32>,
    return
  }
  func.func @transform_0(%arg0: i32) -> (i32, i32, i32, i32) {
    %c0_i32 = arith.constant 0 : i32
    %c0_i32_0 = arith.constant 0 : i32
    %c0_i32_1 = arith.constant 0 : i32
    %c0_i32_2 = arith.constant 0 : i32
    return %c0_i32, %c0_i32_0, %arg0, %c0_i32_1 : i32, i32, i32, i32
  }
  func.func @transform_1(%arg0: i32) -> (i32, i32) {
    %c0_i32 = arith.constant 0 : i32
    %c0_i32_0 = arith.constant 0 : i32
    %c0_i32_1 = arith.constant 0 : i32
    return %c0_i32, %c0_i32_0 : i32, i32
  }
  func.func @transform_2(%arg0: i32) -> (i32, i32) {
    %c0_i32 = arith.constant 0 : i32
    %c0_i32_0 = arith.constant 0 : i32
    %c0_i32_1 = arith.constant 0 : i32
    return %c0_i32, %c0_i32_0 : i32, i32
  }
  func.func @transform_3(%arg0: i32) -> (i32, i32, i32) {
    %c0_i32 = arith.constant 0 : i32
    %c0_i32_0 = arith.constant 0 : i32
    %c0_i32_1 = arith.constant 0 : i32
    %c0_i32_2 = arith.constant 0 : i32
    return %c0_i32, %c0_i32_0, %c0_i32_1 : i32, i32, i32
  }
  func.func @transform_4(%arg0: i32) -> (i32, i32) {
    %c0_i32 = arith.constant 0 : i32
    %c0_i32_0 = arith.constant 0 : i32
    %c0_i32_1 = arith.constant 0 : i32
    return %c0_i32, %c0_i32_0 : i32, i32
  }
  func.func @transform_5(%arg0: i32) -> (i32, i32) {
    %c0_i32 = arith.constant 0 : i32
    %c0_i32_0 = arith.constant 0 : i32
    %c0_i32_1 = arith.constant 0 : i32
    return %c0_i32, %c0_i32_0 : i32, i32
  }
  func.func @transform_6(%arg0: i32) -> (i32, i32) {
    %c0_i32 = arith.constant 0 : i32
    %c0_i32_0 = arith.constant 0 : i32
    %c0_i32_1 = arith.constant 0 : i32
    return %c0_i32, %c0_i32_0 : i32, i32
  }
  func.func @transform_7(%arg0: i32) -> (i32, i32) {
    %c0_i32 = arith.constant 0 : i32
    %c0_i32_0 = arith.constant 0 : i32
    return %arg0, %c0_i32 : i32, i32
  }
}

</mosaic_0001>

<bundles_post_ra>
// kernel: neg.3
= control target key start
LH: loop header
LB: loop body
LE: loop exit
PB: predicated region body
PF: predicated region fallthrough
CT: control target
= control target key end

     0   :  { %2 = vsyncpa [#allocation1], 0  ;;  %s44_s6 = smov [#allocation0]   ;;  %s70_s0 = inlined_call_operand.hbm [shape: f32[768], index: 0, kind: input, shape index: {}]   ;;  %s71_s1 = inlined_call_operand.vmem [shape: f32[768], index: 1, kind: output, shape index: {}]  }
   0x1   :  { %s7_s7 = sshll.u32 %s44_s6, 4  ;;  %s20_s10 = scalar_lea.hbm %s70_s0, 128  ;;  %s8_s7 = int_to_ptr.vmem [resolvable:$true] %s7_s7 }
   0x2   :  { %p21_p0 = scmp.ne.s32.totalorder %s70_s0, %s20_s10  ;;  %p24_p1 = scmp.lt.u32.totalorder %s20_s10, %s70_s0 }
   0x4   :  { %p26_p2 = pnand %p24_p1, %p21_p0 }
   0x6   :  { %29 = shalt.err (!%p26_p2)
}
   0x7   :  { %s30_s15 = scalar_lea.vmem %s8_s7, 128  ;;  %p35_p4 = scmp.lt.s32.totalorder %s8_s7, %s8_s7 }
   0x8   :  { %p31_p3 = scmp.ne.s32.totalorder %s8_s7, %s30_s15  ;;  %p36_p5 = scmp.lt.s32.totalorder %s30_s15, %s30_s15 }
   0xa   :  { %p37_p6 = por %p36_p5, %p35_p4 }
   0xc   :  { %p38_p7 = pnand %p37_p6, %p31_p3 }
   0xe   :  { %41 = shalt.err (!%p38_p7)
}
   0xf   :  { %10 = dma.hbm_to_vmem [thread:$0]  %s70_s0, 128, %s8_s7, [#allocation1]  }
  0x10   :  { %42 = dma.done.wait [#allocation1], 128  }
  0x11   :  { %43 = vsyncadd [#allocation1], 4294967168  ;;  %v12_v0 = vld [vmem:[#allocation0] sm:$0x3f] }
  0x12   :  { %v15_v1 = vxor.u32 2147483648, %v12_v0 }
  0x14   :  { %17 = vst [vmem:[%s71_s1] sm:$0xff] %v15_v1 }
  0x15   :  { %18 = vsyncpa [#allocation1], 1 }

// kernel: auxiliary_head_cifar.1
= control target key start
LH: loop header
LB: loop body
LE: loop exit
PB: predicated region body
PF: predicated region fallthrough
CT: control target
= control target key end

     0   :  { %vm431_vm0 = vcmask 1041408   ;;  %v5631_v0 = vmov 0.0   ;;  %vm4225_vm1 = vmmov 0   ;;  %vm427_vm2 = vcmask 31744   ;;  %s5623_s1 = inlined_call_operand.vmem [shape: bf16[4,128], index: 1, kind: input, shape index: {}]   ;;  %s5624_s0 = inlined_call_operand.vmem [shape: bf16[8,8,16,4], index: 0, kind: input, shape index: {}]   ;;  %s5625_s3 = inlined_call_operand.vmem [shape: bf16[4,128,768], index: 3, kind: input, shape index: {}]   ;;  %s5626_s2 = inlined_call_operand.vmem [shape: f32[1,128], index: 2, kind: input, shape index: {}]   ;;  %s5627_s5 = inlined_call_operand.vmem [shape: bf16[768,128], index: 5, kind: input, shape index: {}]   ;;  %s5628_s4 = inlined_call_operand.vmem [shape: f32[1,768], index: 4, kind: input, shape index: {}]   ;;  %s5629_s6 = inlined_call_operand.vmem [shape: f32[1,128], index: 6, kind: input, shape index: {}]   ;;  %s5630_s7 = inlined_call_operand.vmem [shape: f32[16,128], index: 7, kind: output, shape index: {}]  }
   0x1   :  { %3824 = vmatprep.subr.bf16.mxu1 %v5631_v0  ;;  %v426_v1 = vld [vmem:[%s5623_s1] sm:$0x3]  ;;  %3826 = vmatprep.mubr.msk.bf16.mxu1 %vm4225_vm1, %v5631_v0  ;;  %v4286_v4 = vld [vmem:[%s5624_s0 + $0x8] sm:$0xff]   ;;  %v4291_v5 = vld [vmem:[%s5624_s0 + $0x10] sm:$0xff]  }
   0x2   :  { %v4274_v2 = vsel %vm431_vm0, %v426_v1, 0  ;;  %v4280_v3 = vld [vmem:[%s5624_s0] sm:$0xff]   ;;  %v4296_v6 = vld [vmem:[%s5624_s0 + $0x18] sm:$0xff]   ;;  %v4308_v10 = vld [vmem:[%s5624_s0 + $0x28] sm:$0xff]   ;;  %v3437_v12 = vunpack.c.l.bf16 %v4286_v4  ;;  %v3438_v13 = vunpack.c.h.bf16 %v4286_v4  ;;  %v3441_v14 = vunpack.c.l.bf16 %v4291_v5 }
   0x3   :  { %3825 = vmatpush3.bf16.msra.mxu1 %v4274_v2  ;;  %v4301_v7 = vld [vmem:[%s5624_s0 + $0x20] sm:$0xff]   ;;  %v3433_v8 = vunpack.c.l.bf16 %v4280_v3  ;;  %v3434_v9 = vunpack.c.h.bf16 %v4280_v3  ;;  %v3442_v15 = vunpack.c.h.bf16 %v4291_v5  ;;  %v4322_v16 = vld [vmem:[%s5624_s0 + $0x48] sm:$0xff]   ;;  %v4327_v17 = vld [vmem:[%s5624_s0 + $0x50] sm:$0xff]   ;;  %v3445_v18 = vunpack.c.l.bf16 %v4296_v6 }
   0x4   :  { %3830 = vmatprep.subr.bf16.mxu1 %v5631_v0  ;;  %v4313_v11 = vld [vmem:[%s5624_s0 + $0x40] sm:$0xff]   ;;  %v3446_v19 = vunpack.c.h.bf16 %v4296_v6  ;;  %v3449_v20 = vunpack.c.l.bf16 %v4301_v7  ;;  %v3450_v21 = vunpack.c.h.bf16 %v4301_v7  ;;  %v4336_v22 = vld [vmem:[%s5624_s0 + $0x58] sm:$0xff]   ;;  %v3453_v24 = vunpack.c.l.bf16 %v4308_v10  ;;  %v4350_v28 = vld [vmem:[%s5624_s0 + $0x68] sm:$0xff]  }
   0x5   :  { %v4341_v23 = vld [vmem:[%s5624_s0 + $0x60] sm:$0xff]   ;;  %v3454_v25 = vunpack.c.h.bf16 %v4308_v10  ;;  %v3465_v26 = vunpack.c.l.bf16 %v4313_v11  ;;  %v3466_v27 = vunpack.c.h.bf16 %v4313_v11  ;;  %v3469_v30 = vunpack.c.l.bf16 %v4322_v16  ;;  %v4364_v34 = vld [vmem:[%s5624_s0 + $0x88] sm:$0xff]   ;;  %v4369_v35 = vld [vmem:[%s5624_s0 + $0x90] sm:$0xff]  }
   0x6   :  { %v4355_v29 = vld [vmem:[%s5624_s0 + $0x80] sm:$0xff]   ;;  %v3470_v31 = vunpack.c.h.bf16 %v4322_v16  ;;  %v3473_v32 = vunpack.c.l.bf16 %v4327_v17  ;;  %v3474_v33 = vunpack.c.h.bf16 %v4327_v17  ;;  %v3477_v36 = vunpack.c.l.bf16 %v4336_v22  ;;  %v4378_v40 = vld [vmem:[%s5624_s0 + $0x98] sm:$0xff]   ;;  %v4392_v46 = vld [vmem:[%s5624_s0 + $0xa8] sm:$0xff]  }
   0x7   :  { %v3478_v37 = vunpack.c.h.bf16 %v4336_v22  ;;  %v3481_v38 = vunpack.c.l.bf16 %v4341_v23  ;;  %v3482_v39 = vunpack.c.h.bf16 %v4341_v23  ;;  %v4383_v41 = vld [vmem:[%s5624_s0 + $0xa0] sm:$0xff]   ;;  %v3485_v42 = vunpack.c.l.bf16 %v4350_v28  ;;  %v4406_v52 = vld [vmem:[%s5624_s0 + $0xc8] sm:$0xff]   ;;  %v4411_v53 = vld [vmem:[%s5624_s0 + $0xd0] sm:$0xff]  }
   0x8   :  { %v3486_v43 = vunpack.c.h.bf16 %v4350_v28  ;;  %v3497_v44 = vunpack.c.l.bf16 %v4355_v29  ;;  %v3498_v45 = vunpack.c.h.bf16 %v4355_v29  ;;  %v4397_v47 = vld [vmem:[%s5624_s0 + $0xc0] sm:$0xff]   ;;  %v3501_v48 = vunpack.c.l.bf16 %v4364_v34  ;;  %v4420_v58 = vld [vmem:[%s5624_s0 + $0xd8] sm:$0xff]   ;;  %v4430_v60 = vld [vmem:[%s5624_s0 + $0xe8] sm:$0xff]  }
   0x9   :  { %v3502_v49 = vunpack.c.h.bf16 %v4364_v34  ;;  %v3505_v50 = vunpack.c.l.bf16 %v4369_v35  ;;  %v3506_v51 = vunpack.c.h.bf16 %v4369_v35  ;;  %v3509_v54 = vunpack.c.l.bf16 %v4378_v40  ;;  %v4425_v59 = vld [vmem:[%s5624_s0 + $0xe0] sm:$0xff]   ;;  %v4444_v16 = vld [vmem:[%s5624_s0 + $0x108] sm:$0xff]   ;;  %v4478_v23 = vld [vmem:[%s5624_s0 + $0x110] sm:$0xff]  }
   0xa   :  { %v3510_v55 = vunpack.c.h.bf16 %v4378_v40  ;;  %v3513_v56 = vunpack.c.l.bf16 %v4383_v41  ;;  %v3517_v61 = vunpack.c.l.bf16 %v4392_v46  ;;  %v4439_v11 = vld [vmem:[%s5624_s0 + $0x100] sm:$0xff]   ;;  %v3542_v62 = vunpack.c.h.bf16 %v4420_v58  ;;  %v3894_v29 = vld [vmem:[%s5625_s3 + $0x1b4] ss:$24 sps:$4 sm:$0xff]  }
   0xb   :  { %v3888_v34 = vld [vmem:[%s5625_s3 + $0x184] ss:$24 sps:$4 sm:$0xff]   ;;  %v3549_v17 = vunpack.c.l.bf16 %v4430_v60  ;;  %v3893_v57 = vld [vmem:[%s5625_s3 + $0x180] ss:$24 sps:$4 sm:$0xff]   ;;  %v3565_v0 = vunpack.c.l.bf16 %v4444_v16  ;;  %v187_v1 = vadd.f32 %v3465_v26, %v3433_v8  ;;  %v188_v63 = vadd.f32 %v3466_v27, %v3434_v9  ;;  %v3899_v26 = vld [vmem:[%s5625_s3 + $0x1b0] ss:$24 sps:$4 sm:$0xff]  }
   0xc   :  { %893 = vmatprep.subr.bf16.mxu0 %v3888_v34  ;;  %v189_v22 = vadd.f32 %v3469_v30, %v3437_v12  ;;  %v3566_v34 = vunpack.c.h.bf16 %v4444_v16  ;;  %v4483_v8 = vld [vmem:[%s5624_s0 + $0x118] sm:$0xff]   ;;  %v190_v3 = vadd.f32 %v3470_v31, %v3438_v13  ;;  %v191_v9 = vadd.f32 %v3473_v32, %v3441_v14  ;;  %v4513_v7 = vld [vmem:[%s5624_s0 + $0x120] sm:$0xff]   ;;  %v3906_v35 = vld [vmem:[%s5625_s3 + $0x214] ss:$24 sps:$4 sm:$0xff]  }
   0xd   :  { %v192_v12 = vadd.f32 %v3474_v33, %v3442_v15  ;;  %894 = vmatpush1.bf16.msra.mxu0 %v3893_v57  ;;  %v193_v27 = vadd.f32 %v3477_v36, %v3445_v18  ;;  %v194_v30 = vadd.f32 %v3478_v37, %v3446_v19  ;;  %v195_v4 = vadd.f32 %v3481_v38, %v3449_v20  ;;  %v3900_v5 = vld [vmem:[%s5625_s3 + $0x1e4] ss:$24 sps:$4 sm:$0xff]   ;;  %v3905_v38 = vld [vmem:[%s5625_s3 + $0x1e0] ss:$24 sps:$4 sm:$0xff]  }
   0xe   :  { %v196_v13 = vadd.f32 %v3482_v39, %v3450_v21  ;;  %895 = vmatprep.subr.bf16.mxu0 %v3894_v29  ;;  %v197_v14 = vadd.f32 %v3485_v42, %v3453_v24  ;;  %v219_v15 = vadd.f32 %v3497_v44, %v187_v1  ;;  %v220_v31 = vadd.f32 %v3498_v45, %v188_v63  ;;  %v4518_v21 = vld [vmem:[%s5624_s0 + $0x128] sm:$0xff]  }
   0xf   :  { %v221_v18 = vadd.f32 %v3501_v48, %v189_v22  ;;  %v3569_v6 = vunpack.c.l.bf16 %v4478_v23  ;;  %v3570_v19 = vunpack.c.h.bf16 %v4478_v23  ;;  %v3573_v20 = vunpack.c.l.bf16 %v4483_v8 }
  0x10   :  { %v222_v24 = vadd.f32 %v3502_v49, %v190_v3  ;;  %v3574_v32 = vunpack.c.h.bf16 %v4483_v8  ;;  %v198_v33 = vadd.f32 %v3486_v43, %v3454_v25  ;;  %v223_v36 = vadd.f32 %v3505_v50, %v191_v9  ;;  %v3911_v3 = vld [vmem:[%s5625_s3 + $0x210] ss:$24 sps:$4 sm:$0xff]   ;;  %v3912_v9 = vld [vmem:[%s5625_s3 + $0x244] ss:$24 sps:$4 sm:$0xff]  }
  0x11   :  { %v224_v37 = vadd.f32 %v3506_v51, %v192_v12  ;;  %896 = vmatpush1.bf16.msra.mxu0 %v3899_v26  ;;  %v225_v39 = vadd.f32 %v3509_v54, %v193_v27  ;;  %v226_v10 = vadd.f32 %v3510_v55, %v194_v30  ;;  %v227_v25 = vadd.f32 %v3513_v56, %v195_v4  ;;  %v3716_v8 = vld [vmem:[%s5624_s0 + $0xf0] sm:$0xff]  }
  0x12   :  { %v5633_v28 = vunpack.c.h.bf16 %v4383_v41  ;;  %897 = vmatprep.subr.bf16.mxu0 %v3900_v5  ;;  %v229_v43 = vadd.f32 %v3517_v61, %v197_v14  ;;  %v5634_v44 = vunpack.c.l.bf16 %v4397_v47  ;;  %v5635_v48 = vunpack.c.h.bf16 %v4397_v47 }
  0x13   :  { %v5636_v40 = vunpack.c.l.bf16 %v4406_v52  ;;  %v3577_v51 = vunpack.c.l.bf16 %v4513_v7  ;;  %v3578_v41 = vunpack.c.h.bf16 %v4513_v7  ;;  %v3581_v54 = vunpack.c.l.bf16 %v4518_v21 }
  0x14   :  { %v228_v42 = vadd.f32 %v5633_v28, %v196_v13  ;;  %v251_v45 = vadd.f32 %v5634_v44, %v219_v15  ;;  %v252_v49 = vadd.f32 %v5635_v48, %v220_v31  ;;  %v5637_v55 = vunpack.c.h.bf16 %v4406_v52 }
  0x15   :  { %v253_v50 = vadd.f32 %v5636_v40, %v221_v18  ;;  %v3582_v57 = vunpack.c.h.bf16 %v4518_v21  ;;  %v5638_v61 = vunpack.c.h.bf16 %v4392_v46  ;;  %v5639_v1 = vunpack.c.l.bf16 %v4411_v53  ;;  %898 = vmatpush1.bf16.msra.mxu0 %v3905_v38  ;;  %v3917_v21 = vld [vmem:[%s5625_s3 + $0x240] ss:$24 sps:$4 sm:$0xff]  }
  0x16   :  { %v254_v56 = vadd.f32 %v5637_v55, %v222_v24  ;;  %v5640_v23 = vunpack.c.h.bf16 %v4411_v53  ;;  %v5641_v12 = vunpack.c.l.bf16 %v4420_v58  ;;  %v258_v46 = vadd.f32 %v3542_v62, %v226_v10  ;;  %899 = vmatprep.subr.bf16.mxu0 %v3906_v35 }
  0x17   :  { %v230_v63 = vadd.f32 %v5638_v61, %v198_v33  ;;  %v255_v22 = vadd.f32 %v5639_v1, %v223_v36  ;;  %v5642_v27 = vunpack.c.l.bf16 %v4425_v59  ;;  %v5643_v4 = vunpack.c.h.bf16 %v4425_v59  ;;  %v3693_v59 = vld [vmem:[%s5624_s0 + $0x38] sm:$0xff]  }
  0x18   :  { %v256_v29 = vadd.f32 %v5640_v23, %v224_v37  ;;  %v257_v26 = vadd.f32 %v5641_v12, %v225_v39  ;;  %v261_v5 = vadd.f32 %v3549_v17, %v229_v43  ;;  %v5644_v14 = vunpack.c.l.bf16 %v4439_v11 }
  0x19   :  { %v259_v30 = vadd.f32 %v5642_v27, %v227_v25  ;;  %v260_v13 = vadd.f32 %v5643_v4, %v228_v42  ;;  %v5645_v31 = vunpack.c.h.bf16 %v4439_v11  ;;  %v285_v7 = vadd.f32 %v3565_v0, %v253_v50  ;;  %900 = vmatpush1.bf16.msra.mxu0 %v3911_v3 }
  0x1a   :  { %v283_v15 = vadd.f32 %v5644_v14, %v251_v45  ;;  %v286_v24 = vadd.f32 %v3566_v34, %v254_v56  ;;  %v5646_v33 = vmov %v5634_v44  ;;  %v5647_v36 = vmov %v5644_v14  ;;  %901 = vmatprep.subr.bf16.mxu0 %v3912_v9  ;;  %v3708_v9 = vld [vmem:[%s5624_s0 + $0xb0] sm:$0xff]  }
  0x1b   :  { %v284_v18 = vadd.f32 %v5645_v31, %v252_v49  ;;  %v4592_v37 = vadd.f32 %v5647_v36, %v5646_v33  ;;  %v5648_v38 = vmov %v5635_v48  ;;  %v5649_v39 = vmov %v5645_v31 }
  0x1c   :  { %v4598_v10 = vadd.f32 %v5649_v39, %v5648_v38  ;;  %v5650_v25 = vmov %v5636_v40  ;;  %v5651_v42 = vmov %v5637_v55  ;;  %v5652_v43 = vmov %v5639_v1  ;;  %v3692_v40 = vld [vmem:[%s5624_s0 + $0x30] sm:$0xff]   ;;  %v3701_v1 = vld [vmem:[%s5624_s0 + $0x78] sm:$0xff]  }
  0x1d   :  { %v4604_v28 = vadd.f32 %v3565_v0, %v5650_v25  ;;  %v4610_v35 = vadd.f32 %v3566_v34, %v5651_v42  ;;  %v4614_v44 = vadd.f32 %v3569_v6, %v5652_v43  ;;  %v5653_v47 = vmov %v5640_v23  ;;  %902 = vmatpush1.bf16.msra.mxu0 %v3917_v21 }
  0x1e   :  { %v4618_v11 = vadd.f32 %v3570_v19, %v5653_v47  ;;  %v5654_v45 = vmov %v5641_v12  ;;  %v4628_v52 = vadd.f32 %v3574_v32, %v3542_v62  ;;  %v5655_v16 = vmov %v5642_v27  ;;  %v3717_v12 = vld [vmem:[%s5624_s0 + $0xf8] sm:$0xff]  }
  0x1f   :  { %v4624_v0 = vadd.f32 %v3573_v20, %v5654_v45  ;;  %v4632_v34 = vadd.f32 %v3577_v51, %v5655_v16  ;;  %v5656_v48 = vmov %v5643_v4  ;;  %v4640_v49 = vadd.f32 %v3581_v54, %v3549_v17  ;;  %v3700_v17 = vld [vmem:[%s5624_s0 + $0x70] sm:$0xff]  }
  0x20   :  { %v4636_v53 = vadd.f32 %v3578_v41, %v5656_v48  ;;  %v5657_v58 = vunpack.c.h.bf16 %v4430_v60  ;;  %v287_v56 = vadd.f32 %v3569_v6, %v255_v22  ;;  %v288_v61 = vadd.f32 %v3570_v19, %v256_v29  ;;  %v3709_v29 = vld [vmem:[%s5624_s0 + $0xb8] sm:$0xff]  }
  0x21   :  { %v290_v60 = vadd.f32 %v3574_v32, %v258_v46  ;;  %v291_v23 = vadd.f32 %v3577_v51, %v259_v30  ;;  %v292_v3 = vadd.f32 %v3578_v41, %v260_v13  ;;  %v293_v6 = vadd.f32 %v3581_v54, %v261_v5  ;;  %v3724_v30 = vld [vmem:[%s5624_s0 + $0x130] sm:$0xff]  }
  0x22   :  { %v262_v62 = vadd.f32 %v5657_v58, %v230_v63  ;;  %v5658_v50 = vmov %v5657_v58  ;;  %v289_v63 = vadd.f32 %v3573_v20, %v257_v26  ;;  %v411_v19 = vadd.f32 %v285_v7, %v283_v15  ;;  %v3892_v58 = vld [vmem:[%s5625_s3 + $0x18c] ss:$24 sps:$4 sm:$0xff]  }
  0x23   :  { %v4649_v55 = vadd.f32 %v3582_v57, %v5658_v50  ;;  %v412_v22 = vadd.f32 %v286_v24, %v284_v18  ;;  %v539_v51 = vadd.f32 %v292_v3, %v290_v60  ;;  %v3457_v41 = vunpack.c.l.bf16 %v3692_v40 }
  0x24   :  { %v294_v20 = vadd.f32 %v3582_v57, %v262_v62  ;;  %v538_v32 = vadd.f32 %v291_v23, %v289_v63  ;;  %v413_v54 = vadd.f32 %v411_v19, %v287_v56  ;;  %v3458_v46 = vunpack.c.h.bf16 %v3692_v40  ;;  %v3725_v57 = vld [vmem:[%s5624_s0 + $0x138] sm:$0xff]  }
  0x25   :  { %v414_v26 = vadd.f32 %v412_v22, %v288_v61  ;;  %v3461_v27 = vunpack.c.l.bf16 %v3693_v59  ;;  %v3462_v4 = vunpack.c.h.bf16 %v3693_v59  ;;  %v3489_v13 = vunpack.c.l.bf16 %v3700_v17 }
  0x26   :  { %v3490_v5 = vunpack.c.h.bf16 %v3700_v17  ;;  %v3493_v14 = vunpack.c.l.bf16 %v3701_v1  ;;  %v415_v15 = vadd.f32 %v413_v54, %v289_v63  ;;  %v3494_v18 = vunpack.c.h.bf16 %v3701_v1 }
  0x27   :  { %v416_v31 = vadd.f32 %v414_v26, %v290_v60  ;;  %v3521_v7 = vunpack.c.l.bf16 %v3708_v9  ;;  %v3522_v21 = vunpack.c.h.bf16 %v3708_v9  ;;  %v3525_v24 = vunpack.c.l.bf16 %v3709_v29 }
  0x28   :  { %v3526_v33 = vunpack.c.h.bf16 %v3709_v29  ;;  %v3553_v36 = vunpack.c.l.bf16 %v3716_v8  ;;  %v417_v38 = vadd.f32 %v415_v15, %v291_v23  ;;  %v3554_v25 = vunpack.c.h.bf16 %v3716_v8 }
  0x29   :  { %v418_v39 = vadd.f32 %v416_v31, %v292_v3  ;;  %v3557_v42 = vunpack.c.l.bf16 %v3717_v12  ;;  %v3558_v43 = vunpack.c.h.bf16 %v3717_v12  ;;  %v3585_v47 = vunpack.c.l.bf16 %v3724_v30 }
  0x2a   :  { %v3586_v45 = vunpack.c.h.bf16 %v3724_v30  ;;  %v3589_v16 = vunpack.c.l.bf16 %v3725_v57  ;;  %vm419_vm3 = vcmp.gt.f32.partialorder %v417_v38, 0.0  ;;  %v3590_v48 = vunpack.c.h.bf16 %v3725_v57  ;;  %v3914_v38 = vld [vmem:[%s5625_s3 + $0x248] ss:$24 sps:$4 sm:$0xff]  }
  0x2b   :  { %vm420_vm4 = vcmp.gt.f32.partialorder %v418_v39, 0.0  ;;  %v199_v40 = vadd.f32 %v3489_v13, %v3457_v41  ;;  %v5659_v62 = vmov 0.0   ;;  %v200_v56 = vadd.f32 %v3490_v5, %v3458_v46  ;;  %v3918_v39 = vld [vmem:[%s5625_s3 + $0x274] ss:$24 sps:$4 sm:$0xff]  }
  0x2c   :  { %v2977_v50 = vsel %vm419_vm3, 1.0, %v5659_v62  ;;  %v2978_v59 = vsel %vm420_vm4, 1.0, %v5659_v62  ;;  %v201_v61 = vadd.f32 %v3493_v14, %v3461_v27  ;;  %v202_v1 = vadd.f32 %v3494_v18, %v3462_v4  ;;  %v3898_v14 = vld [vmem:[%s5625_s3 + $0x1bc] ss:$24 sps:$4 sm:$0xff]   ;;  %v3896_v18 = vld [vmem:[%s5625_s3 + $0x1b8] ss:$24 sps:$4 sm:$0xff]   ;;  %903 = vmatprep.subr.bf16.mxu0 %v3918_v39 }
  0x2d   :  { %v425_v17 = vpack.c.bf16 %v2978_v59, %v2977_v50  ;;  %v231_v63 = vadd.f32 %v3521_v7, %v199_v40  ;;  %v4685_v60 = vadd.f32 %v3585_v47, %v3553_v36  ;;  %v232_v23 = vadd.f32 %v3522_v21, %v200_v56  ;;  %v3904_v7 = vld [vmem:[%s5625_s3 + $0x1ec] ss:$24 sps:$4 sm:$0xff]   ;;  %v3902_v21 = vld [vmem:[%s5625_s3 + $0x1e8] ss:$24 sps:$4 sm:$0xff]   ;;  %v3932_v50 = vld [vmem:[%s5625_s3 + $0x2d8] ss:$24 sps:$4 sm:$0xff]  }
  0x2e   :  { %v233_v3 = vadd.f32 %v3525_v24, %v201_v61  ;;  %v4687_v9 = vadd.f32 %v3586_v45, %v3554_v25  ;;  %v4689_v19 = vadd.f32 %v3589_v16, %v3557_v42  ;;  %v540_v22 = vadd.f32 %v538_v32, %v293_v6  ;;  %v3910_v24 = vld [vmem:[%s5625_s3 + $0x21c] ss:$24 sps:$4 sm:$0xff]   ;;  %v3935_v59 = vld [vmem:[%s5625_s3 + $0x2d0] ss:$24 sps:$4 sm:$0xff]   ;;  %v3941_v61 = vld [vmem:[%s5625_s3 + $0xc] ss:$24 sps:$4 sm:$0xff]  }
  0x2f   :  { %3827 = vmatmul.mubr.msk.bf16.vlgmr.msra.gmra.mrb[0].mxu1 %vm427_vm2, %v425_v17  ;;  %v234_v29 = vadd.f32 %v3526_v33, %v202_v1  ;;  %v263_v8 = vadd.f32 %v3553_v36, %v231_v63  ;;  %v4692_v41 = vadd.f32 %v3590_v48, %v3558_v43  ;;  %v541_v12 = vadd.f32 %v539_v51, %v294_v20  ;;  %v3890_v20 = vld [vmem:[%s5625_s3 + $0x188] ss:$24 sps:$4 sm:$0xff]   ;;  %v3908_v33 = vld [vmem:[%s5625_s3 + $0x218] ss:$24 sps:$4 sm:$0xff]   ;;  %v3916_v36 = vld [vmem:[%s5625_s3 + $0x24c] ss:$24 sps:$4 sm:$0xff]  }
  0x30   :  { %3831 = vmatpush3.bf16.msra.mxu1 %v4274_v2  ;;  %3832 = vmatprep.mubr.msk.bf16.mxu1 %vm4225_vm1, %v5659_v62  ;;  %v264_v54 = vadd.f32 %v3554_v25, %v232_v23  ;;  %v265_v26 = vadd.f32 %v3557_v42, %v233_v3  ;;  %v3920_v25 = vld [vmem:[%s5625_s3 + $0x278] ss:$24 sps:$4 sm:$0xff]   ;;  %v3922_v42 = vld [vmem:[%s5625_s3 + $0x27c] ss:$24 sps:$4 sm:$0xff]   ;;  %v4226_v17 = vmov 0   ;;  %v3726_v1 = vld [vmem:[%s5624_s0 + $0x140] sm:$0xff]  }
  0x31   :  { %v266_v46 = vadd.f32 %v3558_v43, %v234_v29  ;;  %v295_v27 = vadd.f32 %v3585_v47, %v263_v8  ;;  %936 = vmatprep.subr.bf16.mxu1 %v3892_v58  ;;  %v3923_v43 = vld [vmem:[%s5625_s3 + $0x270] ss:$24 sps:$4 sm:$0xff]   ;;  %v3924_v47 = vld [vmem:[%s5625_s3 + $0x2a4] ss:$24 sps:$4 sm:$0xff]   ;;  %v3930_v40 = vld [vmem:[%s5625_s3 + $0x2d4] ss:$24 sps:$4 sm:$0xff]   ;;  %925 = vmatprep.mubr.bf16.mxu0 %v4226_v17  ;;  %v3594_v29 = vunpack.c.h.bf16 %v3726_v1 }
  0x32   :  { %v296_v30 = vadd.f32 %v3586_v45, %v264_v54  ;;  %v297_v57 = vadd.f32 %v3589_v16, %v265_v26  ;;  %904 = vmatpush1.bf16.msra.mxu0 %v3923_v43  ;;  %v3926_v45 = vld [vmem:[%s5625_s3 + $0x2a8] ss:$24 sps:$4 sm:$0xff]   ;;  %v3928_v16 = vld [vmem:[%s5625_s3 + $0x2ac] ss:$24 sps:$4 sm:$0xff]   ;;  %v3934_v58 = vld [vmem:[%s5625_s3 + $0x2dc] ss:$24 sps:$4 sm:$0xff]  }
  0x33   :  { %v298_v4 = vadd.f32 %v3590_v48, %v266_v46  ;;  %v542_v13 = vadd.f32 %v540_v22, %v295_v27  ;;  %v3929_v48 = vld [vmem:[%s5625_s3 + $0x2a0] ss:$24 sps:$4 sm:$0xff]   ;;  %905 = vmatprep.subr.bf16.mxu0 %v3924_v47  ;;  %v3938_v56 = vld [vmem:[%s5625_s3 + $0x194] ss:$24 sps:$4 sm:$0xff]   ;;  %v3593_v22 = vunpack.c.l.bf16 %v3726_v1 }
  0x34   :  { %v543_v6 = vadd.f32 %v541_v12, %v296_v30  ;;  %v3727_v63 = vld [vmem:[%s5624_s0 + $0x148] sm:$0xff]   ;;  %v3728_v23 = vld [vmem:[%s5624_s0 + $0x150] sm:$0xff]   ;;  %v3729_v3 = vld [vmem:[%s5624_s0 + $0x158] sm:$0xff]  }
  0x35   :  { %v544_v32 = vadd.f32 %v542_v13, %v297_v57  ;;  %v3730_v8 = vld [vmem:[%s5624_s0 + $0x160] sm:$0xff]   ;;  %v3597_v12 = vunpack.c.l.bf16 %v3727_v63  ;;  %v3598_v54 = vunpack.c.h.bf16 %v3727_v63  ;;  %v3601_v26 = vunpack.c.l.bf16 %v3728_v23  ;;  %v3744_v47 = vld [vmem:[%s5624_s0 + $0x1d0] sm:$0xff]  }
  0x36   :  { %v545_v5 = vadd.f32 %v543_v6, %v298_v4  ;;  %906 = vmatpush1.bf16.msra.mxu0 %v3929_v48  ;;  %v3602_v46 = vunpack.c.h.bf16 %v3728_v23  ;;  %v3605_v27 = vunpack.c.l.bf16 %v3729_v3  ;;  %v3606_v30 = vunpack.c.h.bf16 %v3729_v3  ;;  %v3738_v48 = vld [vmem:[%s5624_s0 + $0x1a0] sm:$0xff]  }
  0x37   :  { %vm546_vm5 = vcmp.gt.f32.partialorder %v544_v32, 0.0  ;;  %907 = vmatprep.subr.bf16.mxu0 %v3930_v40  ;;  %v3609_v57 = vunpack.c.l.bf16 %v3730_v8  ;;  %v3610_v4 = vunpack.c.h.bf16 %v3730_v8  ;;  %v331_v13 = vadd.f32 %v3593_v22, %v4592_v37  ;;  %v3746_v3 = vld [vmem:[%s5624_s0 + $0x1e0] sm:$0xff]  }
  0x38   :  { %vm547_vm6 = vcmp.gt.f32.partialorder %v545_v5, 0.0  ;;  %v2983_v51 = vsel %vm546_vm5, 1.0, %v5659_v62  ;;  %v332_v6 = vadd.f32 %v3594_v29, %v4598_v10  ;;  %v333_v32 = vadd.f32 %v3597_v12, %v4604_v28  ;;  %v3735_v10 = vld [vmem:[%s5624_s0 + $0x188] sm:$0xff]  }
  0x39   :  { %v2984_v15 = vsel %vm547_vm6, 1.0, %v5659_v62  ;;  %v334_v5 = vadd.f32 %v3598_v54, %v4610_v35  ;;  %v339_v28 = vadd.f32 %v3609_v57, %v4632_v34  ;;  %v340_v35 = vadd.f32 %v3610_v4, %v4636_v53  ;;  %v3737_v53 = vld [vmem:[%s5624_s0 + $0x198] sm:$0xff]  }
  0x3a   :  { %v552_v31 = vpack.c.bf16 %v2984_v15, %v2983_v51  ;;  %908 = vmatpush1.bf16.msra.mxu0 %v3935_v59  ;;  %v336_v51 = vadd.f32 %v3602_v46, %v4618_v11  ;;  %v337_v15 = vadd.f32 %v3605_v27, %v4624_v0  ;;  %v3630_v11 = vunpack.c.h.bf16 %v3735_v10  ;;  %v3742_v0 = vld [vmem:[%s5624_s0 + $0x1c0] sm:$0xff]  }
  0x3b   :  { %979 = vmatprep.subr.bf16.mxu0 %v3938_v56  ;;  %v3658_v34 = vunpack.c.h.bf16 %v3742_v0  ;;  %v3638_v43 = vunpack.c.h.bf16 %v3737_v53  ;;  %v3665_v40 = vunpack.c.l.bf16 %v3744_v47  ;;  %v3642_v1 = vunpack.c.h.bf16 %v3738_v48 }
  0x3c   :  { %3833 = vmatmul.mubr.msk.bf16.vlgmr.msra.gmra.mrb[4].mxu1 %vm427_vm2, %v552_v31  ;;  %v338_v31 = vadd.f32 %v3606_v30, %v4628_v52  ;;  %v3743_v52 = vld [vmem:[%s5624_s0 + $0x1c8] sm:$0xff]   ;;  %v3673_v54 = vunpack.c.l.bf16 %v3746_v3 }
  0x3d   :  { %937 = vmatpush1.bf16.msra.mxu1 %v3890_v20  ;;  %968 = vmatprep.mubr.bf16.mxu1 %v4226_v17  ;;  %v335_v20 = vadd.f32 %v3601_v26, %v4614_v44  ;;  %v3629_v44 = vunpack.c.l.bf16 %v3735_v10  ;;  %v3674_v26 = vunpack.c.h.bf16 %v3746_v3  ;;  %v372_v27 = vadd.f32 %v3642_v1, %v340_v35  ;;  %v3956_v1 = vld [vmem:[%s5625_s3 + $0x224] ss:$24 sps:$4 sm:$0xff]   ;;  %v3957_v3 = vld [vmem:[%s5625_s3 + $0x98] ss:$24 sps:$4 sm:$0xff]  }
  0x3e   :  { %938 = vmatprep.subr.bf16.mxu1 %v3898_v14  ;;  %v3734_v14 = vld [vmem:[%s5624_s0 + $0x180] sm:$0xff]   ;;  %v370_v29 = vadd.f32 %v3638_v43, %v338_v31 }
  0x3f   :  { %v3626_v37 = vunpack.c.h.bf16 %v3734_v14 }
  0x41   :  { %939 = vmatpush1.bf16.msra.mxu1 %v3896_v18  ;;  %v3625_v18 = vunpack.c.l.bf16 %v3734_v14  ;;  %v404_v14 = vadd.f32 %v3674_v26, %v372_v27  ;;  %v3971_v26 = vld [vmem:[%s5625_s3 + $0xfc] ss:$24 sps:$4 sm:$0xff]   ;;  %v3969_v27 = vld [vmem:[%s5625_s3 + $0xf8] ss:$24 sps:$4 sm:$0xff]  }
  0x42   :  { %940 = vmatprep.subr.bf16.mxu1 %v3904_v7  ;;  %v3736_v7 = vld [vmem:[%s5624_s0 + $0x190] sm:$0xff]  }
  0x43   :  { %v363_v39 = vadd.f32 %v3625_v18, %v331_v13 }
  0x45   :  { %941 = vmatpush1.bf16.msra.mxu1 %v3902_v21  ;;  %v3633_v21 = vunpack.c.l.bf16 %v3736_v7 }
  0x46   :  { %942 = vmatprep.subr.bf16.mxu1 %v3910_v24  ;;  %v3634_v24 = vunpack.c.h.bf16 %v3736_v7 }
  0x47   :  { %v367_v59 = vadd.f32 %v3633_v21, %v335_v20  ;;  %v4841_v21 = vld [vmem:[%s5626_s2] ss:$0 sm:$0xff] }
  0x48   :  { %v368_v56 = vadd.f32 %v3634_v24, %v336_v51 }
  0x49   :  { %943 = vmatpush1.bf16.msra.mxu1 %v3908_v33  ;;  %v3657_v33 = vunpack.c.l.bf16 %v3742_v0  ;;  %v399_v4 = vadd.f32 %v3665_v40, %v367_v59  ;;  %v3942_v40 = vld [vmem:[%s5625_s3 + $0x1c0] ss:$24 sps:$4 sm:$0xff]   ;;  %v3953_v59 = vld [vmem:[%s5625_s3 + $0x6c] ss:$24 sps:$4 sm:$0xff]  }
  0x4a   :  { %944 = vmatprep.subr.bf16.mxu1 %v3916_v36  ;;  %v3661_v36 = vunpack.c.l.bf16 %v3743_v52 }
  0x4b   :  { %v395_v8 = vadd.f32 %v3657_v33, %v363_v39  ;;  %v3936_v39 = vld [vmem:[%s5625_s3 + $0x190] ss:$24 sps:$4 sm:$0xff]  }
  0x4d   :  { %945 = vmatpush1.bf16.msra.mxu1 %v3914_v38  ;;  %v3662_v38 = vunpack.c.h.bf16 %v3743_v52 }
  0x4e   :  { %946 = vmatprep.subr.bf16.mxu1 %v3922_v42  ;;  %v3637_v42 = vunpack.c.l.bf16 %v3737_v53  ;;  %v4052_v53 = vld [vmem:[%s5625_s3 + $0x394] ss:$24 sps:$4 sm:$0xff]  }
  0x50   :  { %v369_v22 = vadd.f32 %v3637_v42, %v337_v15  ;;  %v3939_v42 = vld [vmem:[%s5625_s3 + $0x8] ss:$24 sps:$4 sm:$0xff]  }
  0x51   :  { %947 = vmatpush1.bf16.msra.mxu1 %v3920_v25  ;;  %v364_v25 = vadd.f32 %v3626_v37, %v332_v6 }
  0x52   :  { %948 = vmatprep.subr.bf16.mxu1 %v3928_v16  ;;  %v366_v16 = vadd.f32 %v3630_v11, %v334_v5 }
  0x53   :  { %v396_v12 = vadd.f32 %v3658_v34, %v364_v25 }
  0x54   :  { %v398_v57 = vadd.f32 %v3662_v38, %v366_v16  ;;  %v4059_v16 = vld [vmem:[%s5625_s3 + $0x3c8] ss:$24 sps:$4 sm:$0xff]  }
  0x55   :  { %949 = vmatpush1.bf16.msra.mxu1 %v3926_v45  ;;  %v365_v45 = vadd.f32 %v3629_v44, %v333_v32 }
  0x56   :  { %950 = vmatprep.subr.bf16.mxu1 %v3934_v58  ;;  %v3666_v58 = vunpack.c.h.bf16 %v3744_v47  ;;  %v1392_v20 = vadd.f32 %v398_v57, %v396_v12  ;;  %v3944_v47 = vld [vmem:[%s5625_s3 + $0x1c4] ss:$24 sps:$4 sm:$0xff]   ;;  %v3963_v12 = vld [vmem:[%s5625_s3 + $0xc8] ss:$24 sps:$4 sm:$0xff]  }
  0x57   :  { %v397_v30 = vadd.f32 %v3661_v36, %v365_v45  ;;  %v3947_v45 = vld [vmem:[%s5625_s3 + $0x3c] ss:$24 sps:$4 sm:$0xff]   ;;  %v3977_v57 = vld [vmem:[%s5625_s3 + $0x12c] ss:$24 sps:$4 sm:$0xff]  }
  0x58   :  { %v400_v13 = vadd.f32 %v3666_v58, %v368_v56  ;;  %v3945_v58 = vld [vmem:[%s5625_s3 + $0x38] ss:$24 sps:$4 sm:$0xff]  }
  0x59   :  { %951 = vmatpush1.bf16.msra.mxu1 %v3932_v50  ;;  %v3745_v50 = vld [vmem:[%s5624_s0 + $0x1d8] sm:$0xff]   ;;  %v1391_v5 = vadd.f32 %v397_v30, %v395_v8  ;;  %v3948_v56 = vld [vmem:[%s5625_s3 + $0x1f0] ss:$24 sps:$4 sm:$0xff]   ;;  %v3974_v30 = vld [vmem:[%s5625_s3 + $0x2b4] ss:$24 sps:$4 sm:$0xff]  }
  0x5a   :  { %1305 = vmatprep.subr.bf16.mxu1 %v3941_v61  ;;  %v3641_v61 = vunpack.c.l.bf16 %v3738_v48  ;;  %v3669_v63 = vunpack.c.l.bf16 %v3745_v50  ;;  %v3670_v23 = vunpack.c.h.bf16 %v3745_v50  ;;  %v1394_v37 = vadd.f32 %v1392_v20, %v400_v13  ;;  %v3950_v50 = vld [vmem:[%s5625_s3 + $0x1f4] ss:$24 sps:$4 sm:$0xff]   ;;  %v3960_v8 = vld [vmem:[%s5625_s3 + $0x250] ss:$24 sps:$4 sm:$0xff]  }
  0x5b   :  { %v1393_v18 = vadd.f32 %v1391_v5, %v399_v4  ;;  %v4227_v48 = vmov 1.0|1.0   ;;  %v3972_v4 = vld [vmem:[%s5625_s3 + $0x2b0] ss:$24 sps:$4 sm:$0xff]   ;;  %v3978_v5 = vld [vmem:[%s5625_s3 + $0x2e0] ss:$24 sps:$4 sm:$0xff]  }
  0x5c   :  { %v371_v46 = vadd.f32 %v3641_v61, %v339_v28  ;;  %v401_v6 = vadd.f32 %v3669_v63, %v369_v22  ;;  %v402_v32 = vadd.f32 %v3670_v23, %v370_v29  ;;  %v3951_v61 = vld [vmem:[%s5625_s3 + $0x68] ss:$24 sps:$4 sm:$0xff]   ;;  %v3959_v63 = vld [vmem:[%s5625_s3 + $0x9c] ss:$24 sps:$4 sm:$0xff]   ;;  %v3965_v29 = vld [vmem:[%s5625_s3 + $0xcc] ss:$24 sps:$4 sm:$0xff]  }
  0x5d   :  { %v3954_v23 = vld [vmem:[%s5625_s3 + $0x220] ss:$24 sps:$4 sm:$0xff]   ;;  %v3962_v22 = vld [vmem:[%s5625_s3 + $0x254] ss:$24 sps:$4 sm:$0xff]  }
  0x5e   :  { %v403_v51 = vadd.f32 %v3673_v54, %v371_v46  ;;  %v1395_v15 = vadd.f32 %v1393_v18, %v401_v6  ;;  %v1396_v31 = vadd.f32 %v1394_v37, %v402_v32  ;;  %v4828_v28 = vadd.f32 %v404_v14, %v402_v32  ;;  %v3968_v54 = vld [vmem:[%s5625_s3 + $0x284] ss:$24 sps:$4 sm:$0xff]   ;;  %v3966_v46 = vld [vmem:[%s5625_s3 + $0x280] ss:$24 sps:$4 sm:$0xff]   ;;  %v3989_v18 = vld [vmem:[%s5625_s3 + $0x34] ss:$24 sps:$4 sm:$0xff]  }
  0x5f   :  { %v3975_v13 = vld [vmem:[%s5625_s3 + $0x128] ss:$24 sps:$4 sm:$0xff]   ;;  %v3983_v32 = vld [vmem:[%s5625_s3 + $0x15c] ss:$24 sps:$4 sm:$0xff]   ;;  %v3981_v20 = vld [vmem:[%s5625_s3 + $0x158] ss:$24 sps:$4 sm:$0xff]  }
  0x60   :  { %v1397_v10 = vadd.f32 %v1395_v15, %v403_v51  ;;  %v1398_v44 = vadd.f32 %v1396_v31, %v404_v14  ;;  %v4826_v11 = vadd.f32 %v403_v51, %v401_v6  ;;  %v3980_v6 = vld [vmem:[%s5625_s3 + $0x2e4] ss:$24 sps:$4 sm:$0xff]   ;;  %v3984_v14 = vld [vmem:[%s5625_s3] ss:$24 sps:$4 sm:$0xff]   ;;  %v3987_v15 = vld [vmem:[%s5625_s3 + $0x30] ss:$24 sps:$4 sm:$0xff]  }
  0x61   :  { %v3986_v51 = vld [vmem:[%s5625_s3 + $0x4] ss:$24 sps:$4 sm:$0xff]  }
  0x62   :  { %vm1399_vm7 = vcmp.gt.f32.partialorder %v1397_v10, 0.0  ;;  %vm1400_vm8 = vcmp.gt.f32.partialorder %v1398_v44, 0.0  ;;  %v4037_v37 = vld [vmem:[%s5625_s3 + $0x30c] ss:$24 sps:$4 sm:$0xff]   ;;  %v3990_v10 = vld [vmem:[%s5625_s3 + $0x60] ss:$24 sps:$4 sm:$0xff]  }
  0x63   :  { %v4831_v35 = vsel %vm1399_vm7, 1.0, %v5659_v62  ;;  %v4834_v7 = vsel %vm1400_vm8, 1.0, %v5659_v62  ;;  %v3992_v31 = vld [vmem:[%s5625_s3 + $0x64] ss:$24 sps:$4 sm:$0xff]   ;;  %v4035_v44 = vld [vmem:[%s5625_s3 + $0x308] ss:$24 sps:$4 sm:$0xff]  }
  0x64   :  { %v1405_v0 = vpack.c.bf16 %v4834_v7, %v4831_v35  ;;  %v4049_v35 = vld [vmem:[%s5625_s3 + $0x36c] ss:$24 sps:$4 sm:$0xff]   ;;  %v3996_v7 = vld [vmem:[%s5625_s3 + $0xc0] ss:$24 sps:$4 sm:$0xff]  }
 0x102   :  { %v469_v52 = vpop.f32.mrb[0].mxu1 }
 0x103   :  { %v3828_v24 = vpop.f32.mrb[1].mxu1  ;;  %vm483_vm9 = vcmp.gt.f32.partialorder %v469_v52, %v4841_v21  ;;  %v3995_v52 = vld [vmem:[%s5625_s3 + $0x94] ss:$24 sps:$4 sm:$0xff]  }
 0x104   :  { %v472_v33 = vpop.f32.mrb[2].mxu1  ;;  %v4043_v24 = vld [vmem:[%s5625_s3 + $0x33c] ss:$24 sps:$4 sm:$0xff]  }
 0x105   :  { %vm484_vm10 = vcmp.gt.f32.partialorder %v472_v33, %v4841_v21  ;;  %v3829_v34 = vpop.f32.mrb[3].mxu1  ;;  %v3993_v33 = vld [vmem:[%s5625_s3 + $0x90] ss:$24 sps:$4 sm:$0xff]  }
 0x106   :  { %vm4845_vm11 = vmpackc.low %vm484_vm10, %vm483_vm9  ;;  %v4041_v34 = vld [vmem:[%s5625_s3 + $0x338] ss:$24 sps:$4 sm:$0xff]  }
 0x10f   :  { %v590_v36 = vpop.f32.mrb[4].mxu1 }
 0x110   :  { %v3834_v38 = vpop.f32.mrb[5].mxu1  ;;  %vm597_vm12 = vcmp.gt.f32.partialorder %v590_v36, %v4841_v21  ;;  %v3998_v36 = vld [vmem:[%s5625_s3 + $0xc4] ss:$24 sps:$4 sm:$0xff]  }
 0x111   :  { %v593_v25 = vpop.f32.mrb[6].mxu1  ;;  %v4001_v38 = vld [vmem:[%s5625_s3 + $0xf4] ss:$24 sps:$4 sm:$0xff]  }
 0x112   :  { %vm598_vm13 = vcmp.gt.f32.partialorder %v593_v25, %v4841_v21  ;;  %v3835_v43 = vpop.f32.mrb[7].mxu1  ;;  %v3999_v25 = vld [vmem:[%s5625_s3 + $0xf0] ss:$24 sps:$4 sm:$0xff]  }
 0x113   :  { %vm4863_vm14 = vmpackc.low %vm598_vm13, %vm597_vm12  ;;  %v4004_v43 = vld [vmem:[%s5625_s3 + $0x124] ss:$24 sps:$4 sm:$0xff]  }
 0x114   :  { %3085 = vmatmul.mubr.msk.bf16.vlgmr.msra.gmra.mrb[0].mxu0 %vm4863_vm14, %v4227_v48  ;;  %3087 = vmatmul.mubr.msk.bf16.vlgmr.msra.gmra.mrb[8].mxu1 %vm4863_vm14, %v4227_v48 }
 0x115   :  { %980 = vmatpush1.bf16.msra.mxu0 %v3936_v39  ;;  %1306 = vmatpush1.bf16.msra.mxu1 %v3939_v42  ;;  %v4055_v39 = vld [vmem:[%s5625_s3 + $0x39c] ss:$24 sps:$4 sm:$0xff]   ;;  %v4053_v42 = vld [vmem:[%s5625_s3 + $0x398] ss:$24 sps:$4 sm:$0xff]  }
 0x116   :  { %981 = vmatprep.subr.bf16.mxu0 %v3944_v47  ;;  %1307 = vmatprep.subr.bf16.mxu1 %v3947_v45  ;;  %v4061_v47 = vld [vmem:[%s5625_s3 + $0x3cc] ss:$24 sps:$4 sm:$0xff]   ;;  %v4002_v45 = vld [vmem:[%s5625_s3 + $0x120] ss:$24 sps:$4 sm:$0xff]  }
 0x117   :  { %1011 = vmatprep.mubr.bf16.mxu0 %v4226_v17  ;;  %1337 = vmatprep.mubr.bf16.mxu1 %v4226_v17 }
 0x119   :  { %982 = vmatpush1.bf16.msra.mxu0 %v3942_v40  ;;  %1308 = vmatpush1.bf16.msra.mxu1 %v3945_v58  ;;  %v4007_v40 = vld [vmem:[%s5625_s3 + $0x154] ss:$24 sps:$4 sm:$0xff]  }
 0x11a   :  { %983 = vmatprep.subr.bf16.mxu0 %v3950_v50  ;;  %1309 = vmatprep.subr.bf16.mxu1 %v3953_v59  ;;  %v4067_v58 = vld [vmem:[%s5625_s3 + $0x3fc] ss:$24 sps:$4 sm:$0xff]   ;;  %v4005_v50 = vld [vmem:[%s5625_s3 + $0x150] ss:$24 sps:$4 sm:$0xff]  }
 0x11b   :  { %v4065_v59 = vld [vmem:[%s5625_s3 + $0x3f8] ss:$24 sps:$4 sm:$0xff]  }
 0x11d   :  { %984 = vmatpush1.bf16.msra.mxu0 %v3948_v56  ;;  %1310 = vmatpush1.bf16.msra.mxu1 %v3951_v61  ;;  %v4010_v56 = vld [vmem:[%s5625_s3 + $0x14] ss:$24 sps:$4 sm:$0xff]  }
 0x11e   :  { %985 = vmatprep.subr.bf16.mxu0 %v3956_v1  ;;  %1311 = vmatprep.subr.bf16.mxu1 %v3959_v63  ;;  %v4073_v61 = vld [vmem:[%s5625_s3 + $0x42c] ss:$24 sps:$4 sm:$0xff]   ;;  %v4008_v1 = vld [vmem:[%s5625_s3 + $0x10] ss:$24 sps:$4 sm:$0xff]  }
 0x11f   :  { %v4013_v63 = vld [vmem:[%s5625_s3 + $0x44] ss:$24 sps:$4 sm:$0xff]  }
 0x121   :  { %986 = vmatpush1.bf16.msra.mxu0 %v3954_v23  ;;  %1312 = vmatpush1.bf16.msra.mxu1 %v3957_v3  ;;  %v4071_v23 = vld [vmem:[%s5625_s3 + $0x428] ss:$24 sps:$4 sm:$0xff]  }
 0x122   :  { %987 = vmatprep.subr.bf16.mxu0 %v3962_v22  ;;  %1313 = vmatprep.subr.bf16.mxu1 %v3965_v29  ;;  %v4011_v3 = vld [vmem:[%s5625_s3 + $0x40] ss:$24 sps:$4 sm:$0xff]   ;;  %v4016_v22 = vld [vmem:[%s5625_s3 + $0x74] ss:$24 sps:$4 sm:$0xff]   ;;  %v4014_v29 = vld [vmem:[%s5625_s3 + $0x70] ss:$24 sps:$4 sm:$0xff]  }
 0x125   :  { %988 = vmatpush1.bf16.msra.mxu0 %v3960_v8  ;;  %1314 = vmatpush1.bf16.msra.mxu1 %v3963_v12  ;;  %v4019_v8 = vld [vmem:[%s5625_s3 + $0xa4] ss:$24 sps:$4 sm:$0xff]   ;;  %v4017_v12 = vld [vmem:[%s5625_s3 + $0xa0] ss:$24 sps:$4 sm:$0xff]  }
 0x126   :  { %989 = vmatprep.subr.bf16.mxu0 %v3968_v54  ;;  %1315 = vmatprep.subr.bf16.mxu1 %v3971_v26  ;;  %v4022_v54 = vld [vmem:[%s5625_s3 + $0xd4] ss:$24 sps:$4 sm:$0xff]   ;;  %v4020_v26 = vld [vmem:[%s5625_s3 + $0xd0] ss:$24 sps:$4 sm:$0xff]  }
 0x129   :  { %990 = vmatpush1.bf16.msra.mxu0 %v3966_v46  ;;  %1316 = vmatpush1.bf16.msra.mxu1 %v3969_v27  ;;  %v4025_v46 = vld [vmem:[%s5625_s3 + $0x104] ss:$24 sps:$4 sm:$0xff]   ;;  %v4023_v27 = vld [vmem:[%s5625_s3 + $0x100] ss:$24 sps:$4 sm:$0xff]  }
 0x12a   :  { %991 = vmatprep.subr.bf16.mxu0 %v3974_v30  ;;  %1317 = vmatprep.subr.bf16.mxu1 %v3977_v57  ;;  %v4028_v30 = vld [vmem:[%s5625_s3 + $0x134] ss:$24 sps:$4 sm:$0xff]   ;;  %v4026_v57 = vld [vmem:[%s5625_s3 + $0x130] ss:$24 sps:$4 sm:$0xff]  }
 0x12d   :  { %992 = vmatpush1.bf16.msra.mxu0 %v3972_v4  ;;  %1318 = vmatpush1.bf16.msra.mxu1 %v3975_v13  ;;  %v4031_v4 = vld [vmem:[%s5625_s3 + $0x164] ss:$24 sps:$4 sm:$0xff]   ;;  %v4029_v13 = vld [vmem:[%s5625_s3 + $0x160] ss:$24 sps:$4 sm:$0xff]  }
 0x12e   :  { %993 = vmatprep.subr.bf16.mxu0 %v3980_v6  ;;  %1319 = vmatprep.subr.bf16.mxu1 %v3983_v32  ;;  %v4034_v6 = vld [vmem:[%s5625_s3 + $0x304] ss:$24 sps:$4 sm:$0xff]   ;;  %v4032_v32 = vld [vmem:[%s5625_s3 + $0x300] ss:$24 sps:$4 sm:$0xff]  }
 0x131   :  { %994 = vmatpush1.bf16.msra.mxu0 %v3978_v5  ;;  %1320 = vmatpush1.bf16.msra.mxu1 %v3981_v20  ;;  %v4040_v5 = vld [vmem:[%s5625_s3 + $0x334] ss:$24 sps:$4 sm:$0xff]   ;;  %v4038_v20 = vld [vmem:[%s5625_s3 + $0x330] ss:$24 sps:$4 sm:$0xff]  }
 0x132   :  { %1262 = vmatprep.subr.bf16.mxu0 %v3986_v51  ;;  %3836 = vmatprep.subr.bf16.mxu1 %v5659_v62  ;;  %v4046_v51 = vld [vmem:[%s5625_s3 + $0x364] ss:$24 sps:$4 sm:$0xff]  }
 0x134   :  { %3089 = vmatmul.mubr.msk.bf16.vlgmr.msra.gmra.mrb[4].mxu0 %vm4863_vm14, %v4227_v48  ;;  %3141 = vmatmul.mubr.msk.bf16.vlgmr.msra.gmra.mrb[8].mxu1 %vm4845_vm11, %v4227_v48 }
 0x135   :  { %1263 = vmatpush1.bf16.msra.mxu0 %v3984_v14  ;;  %3837 = vmatpush3.bf16.msra.mxu1 %v4274_v2  ;;  %v4044_v14 = vld [vmem:[%s5625_s3 + $0x360] ss:$24 sps:$4 sm:$0xff]  }
 0x136   :  { %1264 = vmatprep.subr.bf16.mxu0 %v3989_v18  ;;  %3838 = vmatprep.mubr.msk.bf16.mxu1 %vm4225_vm1, %v5659_v62  ;;  %v4050_v18 = vld [vmem:[%s5625_s3 + $0x390] ss:$24 sps:$4 sm:$0xff]  }
 0x137   :  { %1294 = vmatprep.mubr.bf16.mxu0 %v4226_v17  ;;  %1789 = vmatprep.subr.bf16.mxu1 %v4037_v37  ;;  %v4058_v37 = vld [vmem:[%s5625_s3 + $0x3c4] ss:$24 sps:$4 sm:$0xff]  }
 0x139   :  { %1265 = vmatpush1.bf16.msra.mxu0 %v3987_v15  ;;  %v4056_v15 = vld [vmem:[%s5625_s3 + $0x3c0] ss:$24 sps:$4 sm:$0xff]  }
 0x13a   :  { %1266 = vmatprep.subr.bf16.mxu0 %v3992_v31  ;;  %v4064_v31 = vld [vmem:[%s5625_s3 + $0x3f4] ss:$24 sps:$4 sm:$0xff]  }
 0x13c   :  { %3839 = vmatmul.mubr.msk.bf16.vlgmr.msra.gmra.mrb[12].mxu1 %vm427_vm2, %v1405_v0  ;;  %v4047_v0 = vld [vmem:[%s5625_s3 + $0x368] ss:$24 sps:$4 sm:$0xff]  }
 0x13d   :  { %1267 = vmatpush1.bf16.msra.mxu0 %v3990_v10  ;;  %1790 = vmatpush1.bf16.msra.mxu1 %v4035_v44  ;;  %v4062_v10 = vld [vmem:[%s5625_s3 + $0x3f0] ss:$24 sps:$4 sm:$0xff]   ;;  %v4070_v44 = vld [vmem:[%s5625_s3 + $0x424] ss:$24 sps:$4 sm:$0xff]  }
 0x13e   :  { %1268 = vmatprep.subr.bf16.mxu0 %v3995_v52  ;;  %1791 = vmatprep.subr.bf16.mxu1 %v4043_v24  ;;  %v3731_v52 = vld [vmem:[%s5624_s0 + $0x168] sm:$0xff]   ;;  %v4068_v24 = vld [vmem:[%s5625_s3 + $0x420] ss:$24 sps:$4 sm:$0xff]  }
 0x13f   :  { %1821 = vmatprep.mubr.bf16.mxu1 %v4226_v17 }
 0x141   :  { %1269 = vmatpush1.bf16.msra.mxu0 %v3993_v33  ;;  %1792 = vmatpush1.bf16.msra.mxu1 %v4041_v34  ;;  %v3613_v33 = vunpack.c.l.bf16 %v3731_v52  ;;  %v3614_v34 = vunpack.c.h.bf16 %v3731_v52 }
 0x142   :  { %1270 = vmatprep.subr.bf16.mxu0 %v3998_v36  ;;  %1793 = vmatprep.subr.bf16.mxu1 %v4049_v35  ;;  %v3732_v36 = vld [vmem:[%s5624_s0 + $0x170] sm:$0xff]   ;;  %v3739_v35 = vld [vmem:[%s5624_s0 + $0x1a8] sm:$0xff]  }
 0x145   :  { %1271 = vmatpush1.bf16.msra.mxu0 %v3996_v7  ;;  %1794 = vmatpush1.bf16.msra.mxu1 %v4047_v0  ;;  %v4076_v7 = vld [vmem:[%s5625_s3 + $0x454] ss:$24 sps:$4 sm:$0xff]   ;;  %v3617_v0 = vunpack.c.l.bf16 %v3732_v36 }
 0x146   :  { %1272 = vmatprep.subr.bf16.mxu0 %v4001_v38  ;;  %1795 = vmatprep.subr.bf16.mxu1 %v4055_v39  ;;  %v3618_v38 = vunpack.c.h.bf16 %v3732_v36  ;;  %v341_v39 = vadd.f32 %v3613_v33, %v4640_v49  ;;  %v4077_v49 = vld [vmem:[%s5625_s3 + $0x458] ss:$24 sps:$4 sm:$0xff]  }
 0x149   :  { %1273 = vmatpush1.bf16.msra.mxu0 %v3999_v25  ;;  %1796 = vmatpush1.bf16.msra.mxu1 %v4053_v42  ;;  %v342_v25 = vadd.f32 %v3614_v34, %v4649_v55  ;;  %v4074_v42 = vld [vmem:[%s5625_s3 + $0x450] ss:$24 sps:$4 sm:$0xff]  }
 0x14a   :  { %1274 = vmatprep.subr.bf16.mxu0 %v4004_v43  ;;  %1797 = vmatprep.subr.bf16.mxu1 %v4061_v47  ;;  %v4079_v43 = vld [vmem:[%s5625_s3 + $0x45c] ss:$24 sps:$4 sm:$0xff]  }
 0x14b   :  { %v3733_v47 = vld [vmem:[%s5624_s0 + $0x178] sm:$0xff]  }
 0x14c   :  { %v3621_v55 = vunpack.c.l.bf16 %v3733_v47 }
 0x14d   :  { %1275 = vmatpush1.bf16.msra.mxu0 %v4002_v45  ;;  %1798 = vmatpush1.bf16.msra.mxu1 %v4059_v16  ;;  %v3645_v45 = vunpack.c.l.bf16 %v3739_v35  ;;  %v3646_v16 = vunpack.c.h.bf16 %v3739_v35 }
 0x14e   :  { %1276 = vmatprep.subr.bf16.mxu0 %v4007_v40  ;;  %1799 = vmatprep.subr.bf16.mxu1 %v4067_v58  ;;  %v3622_v40 = vunpack.c.h.bf16 %v3733_v47  ;;  %v3740_v58 = vld [vmem:[%s5624_s0 + $0x1b0] sm:$0xff]   ;;  %v4089_v47 = vld [vmem:[%s5625_s3 + $0x3a0] ss:$24 sps:$4 sm:$0xff]  }
 0x151   :  { %1277 = vmatpush1.bf16.msra.mxu0 %v4005_v50  ;;  %1800 = vmatpush1.bf16.msra.mxu1 %v4065_v59  ;;  %v3747_v50 = vld [vmem:[%s5624_s0 + $0x1e8] sm:$0xff]   ;;  %v343_v59 = vadd.f32 %v3617_v0, %v4685_v60  ;;  %v4181_v0 = vld [vmem:[%s5627_s5 + $0x10] sm:$0xff]  }
 0x152   :  { %1348 = vmatprep.subr.bf16.mxu0 %v4010_v56  ;;  %1801 = vmatprep.subr.bf16.mxu1 %v4073_v61  ;;  %v344_v56 = vadd.f32 %v3618_v38, %v4687_v9  ;;  %v3649_v61 = vunpack.c.l.bf16 %v3740_v58  ;;  %v4082_v60 = vld [vmem:[%s5625_s3 + $0x314] ss:$24 sps:$4 sm:$0xff]  }
 0x153   :  { %v4109_v38 = vld [vmem:[%s5625_s3 + $0x48c] ss:$24 sps:$4 sm:$0xff]  }
 0x154   :  { %3139 = vmatmul.mubr.msk.bf16.vlgmr.msra.gmra.mrb[0].mxu0 %vm4845_vm11, %v4227_v48 }
 0x155   :  { %1349 = vmatpush1.bf16.msra.mxu0 %v4008_v1  ;;  %1380 = vmatprep.mubr.bf16.mxu0 %v4226_v17  ;;  %v3650_v1 = vunpack.c.h.bf16 %v3740_v58  ;;  %v4097_v58 = vld [vmem:[%s5625_s3 + $0x404] ss:$24 sps:$4 sm:$0xff]  }
 0x156   :  { %1350 = vmatprep.subr.bf16.mxu0 %v4013_v63  ;;  %1802 = vmatpush1.bf16.msra.mxu1 %v4071_v23  ;;  %v3741_v63 = vld [vmem:[%s5624_s0 + $0x1b8] sm:$0xff]   ;;  %v3677_v23 = vunpack.c.l.bf16 %v3747_v50 }
 0x157   :  { %1803 = vmatprep.subr.bf16.mxu1 %v4079_v43  ;;  %v3653_v9 = vunpack.c.l.bf16 %v3741_v63  ;;  %v4091_v43 = vld [vmem:[%s5625_s3 + $0x3a4] ss:$24 sps:$4 sm:$0xff]  }
 0x159   :  { %1351 = vmatpush1.bf16.msra.mxu0 %v4011_v3  ;;  %v3678_v3 = vunpack.c.h.bf16 %v3747_v50  ;;  %v4127_v50 = vld [vmem:[%s5625_s3 + $0x51c] ss:$24 sps:$4 sm:$0xff]  }
 0x15a   :  { %1352 = vmatprep.subr.bf16.mxu0 %v4016_v22  ;;  %v3748_v22 = vld [vmem:[%s5624_s0 + $0x1f0] sm:$0xff]   ;;  %1804 = vmatpush1.bf16.msra.mxu1 %v4077_v49  ;;  %v4121_v49 = vld [vmem:[%s5625_s3 + $0x4ec] ss:$24 sps:$4 sm:$0xff]  }
 0x15b   :  { %3842 = vmatprep.subr.bf16.mxu1 %v5659_v62 }
 0x15d   :  { %1353 = vmatpush1.bf16.msra.mxu0 %v4014_v29  ;;  %v3654_v29 = vunpack.c.h.bf16 %v3741_v63  ;;  %v4098_v63 = vld [vmem:[%s5625_s3 + $0x430] ss:$24 sps:$4 sm:$0xff]  }
 0x15e   :  { %1354 = vmatprep.subr.bf16.mxu0 %v4019_v8  ;;  %v3681_v8 = vunpack.c.l.bf16 %v3748_v22 }
 0x161   :  { %1355 = vmatpush1.bf16.msra.mxu0 %v4017_v12  ;;  %v3682_v12 = vunpack.c.h.bf16 %v3748_v22  ;;  %v4139_v22 = vld [vmem:[%s5625_s3 + $0x57c] ss:$24 sps:$4 sm:$0xff]  }
 0x162   :  { %1356 = vmatprep.subr.bf16.mxu0 %v4022_v54  ;;  %v3749_v54 = vld [vmem:[%s5624_s0 + $0x1f8] sm:$0xff]  }
 0x165   :  { %1357 = vmatpush1.bf16.msra.mxu0 %v4020_v26  ;;  %v345_v26 = vadd.f32 %v3621_v55, %v4689_v19  ;;  %v4092_v55 = vld [vmem:[%s5625_s3 + $0x3d0] ss:$24 sps:$4 sm:$0xff]  }
 0x166   :  { %1358 = vmatprep.subr.bf16.mxu0 %v4025_v46  ;;  %v346_v46 = vadd.f32 %v3622_v40, %v4692_v41  ;;  %v4119_v40 = vld [vmem:[%s5625_s3 + $0x4e8] ss:$24 sps:$4 sm:$0xff]  }
 0x169   :  { %1359 = vmatpush1.bf16.msra.mxu0 %v4023_v27  ;;  %v373_v27 = vadd.f32 %v3645_v45, %v341_v39  ;;  %v4083_v39 = vld [vmem:[%s5625_s3 + $0x340] ss:$24 sps:$4 sm:$0xff]  }
 0x16a   :  { %1360 = vmatprep.subr.bf16.mxu0 %v4028_v30  ;;  %v374_v30 = vadd.f32 %v3646_v16, %v342_v25  ;;  %v4088_v25 = vld [vmem:[%s5625_s3 + $0x374] ss:$24 sps:$4 sm:$0xff]   ;;  %v4113_v45 = vld [vmem:[%s5625_s3 + $0x4b8] ss:$24 sps:$4 sm:$0xff]  }
 0x16b   :  { %v4094_v16 = vld [vmem:[%s5625_s3 + $0x3d4] ss:$24 sps:$4 sm:$0xff]  }
 0x16d   :  { %1361 = vmatpush1.bf16.msra.mxu0 %v4026_v57  ;;  %v3685_v57 = vunpack.c.l.bf16 %v3749_v54 }
 0x16e   :  { %1362 = vmatprep.subr.bf16.mxu0 %v4031_v4  ;;  %v3686_v4 = vunpack.c.h.bf16 %v3749_v54  ;;  %v4143_v54 = vld [vmem:[%s5625_s3 + $0x5a8] ss:$24 sps:$4 sm:$0xff]  }
 0x171   :  { %1363 = vmatpush1.bf16.msra.mxu0 %v4029_v13  ;;  %v375_v13 = vadd.f32 %v3649_v61, %v343_v59  ;;  %v4095_v59 = vld [vmem:[%s5625_s3 + $0x400] ss:$24 sps:$4 sm:$0xff]   ;;  %v4100_v61 = vld [vmem:[%s5625_s3 + $0x434] ss:$24 sps:$4 sm:$0xff]  }
 0x172   :  { %1746 = vmatprep.subr.bf16.mxu0 %v4034_v6  ;;  %v376_v6 = vadd.f32 %v3650_v1, %v344_v56  ;;  %v4125_v56 = vld [vmem:[%s5625_s3 + $0x518] ss:$24 sps:$4 sm:$0xff]   ;;  %v4133_v1 = vld [vmem:[%s5625_s3 + $0x54c] ss:$24 sps:$4 sm:$0xff]  }
 0x174   :  { %3143 = vmatmul.mubr.msk.bf16.vlgmr.msra.gmra.mrb[4].mxu0 %vm4845_vm11, %v4227_v48 }
 0x175   :  { %1747 = vmatpush1.bf16.msra.mxu0 %v4032_v32  ;;  %1778 = vmatprep.mubr.bf16.mxu0 %v4226_v17  ;;  %v377_v32 = vadd.f32 %v3653_v9, %v345_v26  ;;  %v4137_v9 = vld [vmem:[%s5625_s3 + $0x578] ss:$24 sps:$4 sm:$0xff]   ;;  %v4112_v26 = vld [vmem:[%s5625_s3 + $0x4b4] ss:$24 sps:$4 sm:$0xff]  }
 0x176   :  { %1748 = vmatprep.subr.bf16.mxu0 %v4040_v5  ;;  %v378_v5 = vadd.f32 %v3654_v29, %v346_v46  ;;  %v4106_v29 = vld [vmem:[%s5625_s3 + $0x484] ss:$24 sps:$4 sm:$0xff]   ;;  %v4110_v46 = vld [vmem:[%s5625_s3 + $0x4b0] ss:$24 sps:$4 sm:$0xff]  }
 0x179   :  { %1749 = vmatpush1.bf16.msra.mxu0 %v4038_v20  ;;  %v405_v20 = vadd.f32 %v3677_v23, %v373_v27  ;;  %v4131_v23 = vld [vmem:[%s5625_s3 + $0x548] ss:$24 sps:$4 sm:$0xff]   ;;  %v4118_v27 = vld [vmem:[%s5625_s3 + $0x4e4] ss:$24 sps:$4 sm:$0xff]  }
 0x17a   :  { %1750 = vmatprep.subr.bf16.mxu0 %v4046_v51  ;;  %v406_v51 = vadd.f32 %v3678_v3, %v374_v30  ;;  %v4103_v3 = vld [vmem:[%s5625_s3 + $0x464] ss:$24 sps:$4 sm:$0xff]   ;;  %v4116_v30 = vld [vmem:[%s5625_s3 + $0x4e0] ss:$24 sps:$4 sm:$0xff]  }
 0x17c   :  { %v1890_v19 = vadd.f32 %v4828_v28, %v406_v51  ;;  %v4140_v51 = vld [vmem:[%s5625_s3 + $0x5a0] ss:$24 sps:$4 sm:$0xff]  }
 0x17d   :  { %1751 = vmatpush1.bf16.msra.mxu0 %v4044_v14  ;;  %v407_v14 = vadd.f32 %v3681_v8, %v375_v13  ;;  %v4145_v8 = vld [vmem:[%s5625_s3 + $0x5ac] ss:$24 sps:$4 sm:$0xff]  }
 0x17e   :  { %1752 = vmatprep.subr.bf16.mxu0 %v4052_v53  ;;  %v408_v53 = vadd.f32 %v3682_v12, %v376_v6  ;;  %v4104_v12 = vld [vmem:[%s5625_s3 + $0x480] ss:$24 sps:$4 sm:$0xff]   ;;  %v4130_v13 = vld [vmem:[%s5625_s3 + $0x544] ss:$24 sps:$4 sm:$0xff]  }
 0x17f   :  { %v4128_v6 = vld [vmem:[%s5625_s3 + $0x540] ss:$24 sps:$4 sm:$0xff]  }
 0x181   :  { %1753 = vmatpush1.bf16.msra.mxu0 %v4050_v18  ;;  %v409_v18 = vadd.f32 %v3685_v57, %v377_v32  ;;  %v4124_v57 = vld [vmem:[%s5625_s3 + $0x514] ss:$24 sps:$4 sm:$0xff]  }
 0x182   :  { %1754 = vmatprep.subr.bf16.mxu0 %v4058_v37  ;;  %v410_v37 = vadd.f32 %v3686_v4, %v378_v5  ;;  %v4122_v4 = vld [vmem:[%s5625_s3 + $0x510] ss:$24 sps:$4 sm:$0xff]   ;;  %v4136_v32 = vld [vmem:[%s5625_s3 + $0x574] ss:$24 sps:$4 sm:$0xff]  }
 0x183   :  { %v4134_v5 = vld [vmem:[%s5625_s3 + $0x570] ss:$24 sps:$4 sm:$0xff]  }
 0x185   :  { %1755 = vmatpush1.bf16.msra.mxu0 %v4056_v15  ;;  %v1889_v15 = vadd.f32 %v4826_v11, %v405_v20  ;;  %v4080_v11 = vld [vmem:[%s5625_s3 + $0x310] ss:$24 sps:$4 sm:$0xff]   ;;  %v4142_v20 = vld [vmem:[%s5625_s3 + $0x5a4] ss:$24 sps:$4 sm:$0xff]  }
 0x186   :  { %1756 = vmatprep.subr.bf16.mxu0 %v4064_v31  ;;  %v1892_v31 = vadd.f32 %v1890_v19, %v408_v53  ;;  %v4146_v53 = vld [vmem:[%s5625_s3 + $0x5d0] ss:$24 sps:$4 sm:$0xff]   ;;  %v4176_v19 = vld [vmem:[%s5627_s5 + $0x40] sm:$0xff]  }
 0x187   :  { %v1891_v41 = vadd.f32 %v1889_v15, %v407_v14  ;;  %v4148_v14 = vld [vmem:[%s5625_s3 + $0x5d4] ss:$24 sps:$4 sm:$0xff]  }
 0x188   :  { %v4154_v15 = vld [vmem:[%s5625_s3 + $0x494] ss:$24 sps:$4 sm:$0xff]  }
 0x189   :  { %1757 = vmatpush1.bf16.msra.mxu0 %v4062_v10  ;;  %v1893_v10 = vadd.f32 %v1891_v41, %v409_v18  ;;  %v4151_v18 = vld [vmem:[%s5625_s3 + $0x5dc] ss:$24 sps:$4 sm:$0xff]  }
 0x18a   :  { %1758 = vmatprep.subr.bf16.mxu0 %v4070_v44  ;;  %v1894_v44 = vadd.f32 %v1892_v31, %v410_v37  ;;  %v4149_v37 = vld [vmem:[%s5625_s3 + $0x5d8] ss:$24 sps:$4 sm:$0xff]  }
 0x18b   :  { %vm1895_vm15 = vcmp.gt.f32.partialorder %v1893_v10, 0.0 }
 0x18c   :  { %vm1896_vm0 = vcmp.gt.f32.partialorder %v1894_v44, 0.0  ;;  %v3251_v52 = vsel %vm1895_vm15, 1.0, %v5659_v62  ;;  %v4152_v44 = vld [vmem:[%s5625_s3 + $0x490] ss:$24 sps:$4 sm:$0xff]  }
 0x18d   :  { %1759 = vmatpush1.bf16.msra.mxu0 %v4068_v24  ;;  %v3252_v24 = vsel %vm1896_vm0, 1.0, %v5659_v62 }
 0x18e   :  { %1760 = vmatprep.subr.bf16.mxu0 %v4076_v7  ;;  %v1901_v33 = vpack.c.bf16 %v3252_v24, %v3251_v52  ;;  %v4085_v7 = vld [vmem:[%s5625_s3 + $0x344] ss:$24 sps:$4 sm:$0xff]  }
 0x18f   :  { %v4157_v24 = vld [vmem:[%s5625_s3 + $0x4c4] ss:$24 sps:$4 sm:$0xff]  }
 0x191   :  { %1761 = vmatpush1.bf16.msra.mxu0 %v4074_v42  ;;  %v4107_v42 = vld [vmem:[%s5625_s3 + $0x488] ss:$24 sps:$4 sm:$0xff]  }
 0x192   :  { %1832 = vmatprep.subr.bf16.mxu0 %v4082_v60  ;;  %v4101_v60 = vld [vmem:[%s5625_s3 + $0x460] ss:$24 sps:$4 sm:$0xff]  }
 0x20f   :  { %v1443_v34 = vpop.f32.mrb[12].mxu1 }
 0x210   :  { %v3840_v36 = vpop.f32.mrb[13].mxu1  ;;  %vm1450_vm3 = vcmp.gt.f32.partialorder %v1443_v34, %v4841_v21 }
 0x211   :  { %v1446_v35 = vpop.f32.mrb[14].mxu1  ;;  %v4178_v36 = vld [vmem:[%s5627_s5 + $0x48] sm:$0xff]  }
 0x212   :  { %vm1451_vm4 = vcmp.gt.f32.partialorder %v1446_v35, %v4841_v21  ;;  %v3841_v28 = vpop.f32.mrb[15].mxu1  ;;  %v4160_v35 = vld [vmem:[%s5625_s3 + $0x4f4] ss:$24 sps:$4 sm:$0xff]  }
 0x213   :  { %vm5218_vm5 = vmpackc.low %vm1451_vm4, %vm1450_vm3  ;;  %v4180_v28 = vld [vmem:[%s5627_s5 + $0x50] sm:$0xff]  }
 0x214   :  { %3246 = vmatmul.mubr.msk.bf16.vlgmr.msra.gmra.mrb[0].mxu0 %vm5218_vm5, %v4227_v48  ;;  %3248 = vmatmul.mubr.msk.bf16.vlgmr.msra.gmra.mrb[8].mxu1 %vm5218_vm5, %v4227_v48 }
 0x215   :  { %1833 = vmatpush1.bf16.msra.mxu0 %v4080_v11  ;;  %3843 = vmatpush3.bf16.msra.mxu1 %v4274_v2  ;;  %v4086_v2 = vld [vmem:[%s5625_s3 + $0x370] ss:$24 sps:$4 sm:$0xff]  }
 0x216   :  { %1834 = vmatprep.subr.bf16.mxu0 %v4085_v7  ;;  %3844 = vmatprep.mubr.msk.bf16.mxu1 %vm4225_vm1, %v5659_v62  ;;  %v4115_v62 = vld [vmem:[%s5625_s3 + $0x4bc] ss:$24 sps:$4 sm:$0xff]   ;;  %v4179_v11 = vld [vmem:[%s5627_s5 + $0x8] sm:$0xff]  }
 0x217   :  { %1864 = vmatprep.mubr.bf16.mxu0 %v4226_v17  ;;  %2285 = vmatprep.subr.bf16.mxu1 %v4109_v38  ;;  %v4163_v7 = vld [vmem:[%s5625_s3 + $0x524] ss:$24 sps:$4 sm:$0xff]  }
 0x218   :  { %v4182_v38 = vld [vmem:[%s5627_s5 + $0x58] sm:$0xff]  }
 0x219   :  { %1835 = vmatpush1.bf16.msra.mxu0 %v4083_v39  ;;  %v4161_v39 = vld [vmem:[%s5625_s3 + $0x520] ss:$24 sps:$4 sm:$0xff]  }
 0x21a   :  { %1836 = vmatprep.subr.bf16.mxu0 %v4088_v25  ;;  %v4166_v25 = vld [vmem:[%s5625_s3 + $0x554] ss:$24 sps:$4 sm:$0xff]  }
 0x21c   :  { %3845 = vmatmul.mubr.msk.bf16.vlgmr.msra.gmra.mrb[16].mxu1 %vm427_vm2, %v1901_v33  ;;  %v4177_v33 = vld [vmem:[%s5627_s5] sm:$0xff]  }
 0x21d   :  { %1837 = vmatpush1.bf16.msra.mxu0 %v4086_v2  ;;  %2286 = vmatpush1.bf16.msra.mxu1 %v4107_v42  ;;  %v4183_v2 = vld [vmem:[%s5627_s5 + $0x18] sm:$0xff]   ;;  %v4184_v42 = vld [vmem:[%s5627_s5 + $0x60] sm:$0xff]  }
 0x21e   :  { %1838 = vmatprep.subr.bf16.mxu0 %v4091_v43  ;;  %2287 = vmatprep.subr.bf16.mxu1 %v4115_v62  ;;  %v4164_v43 = vld [vmem:[%s5625_s3 + $0x550] ss:$24 sps:$4 sm:$0xff]   ;;  %v4169_v62 = vld [vmem:[%s5625_s3 + $0x584] ss:$24 sps:$4 sm:$0xff]  }
 0x21f   :  { %2317 = vmatprep.mubr.bf16.mxu1 %v4226_v17 }
 0x221   :  { %1839 = vmatpush1.bf16.msra.mxu0 %v4089_v47  ;;  %2288 = vmatpush1.bf16.msra.mxu1 %v4113_v45  ;;  %v4185_v47 = vld [vmem:[%s5627_s5 + $0x20] sm:$0xff]   ;;  %v4186_v45 = vld [vmem:[%s5627_s5 + $0x68] sm:$0xff]  }
 0x222   :  { %1840 = vmatprep.subr.bf16.mxu0 %v4094_v16  ;;  %2289 = vmatprep.subr.bf16.mxu1 %v4121_v49  ;;  %v4167_v16 = vld [vmem:[%s5625_s3 + $0x580] ss:$24 sps:$4 sm:$0xff]   ;;  %v4172_v49 = vld [vmem:[%s5625_s3 + $0x5b4] ss:$24 sps:$4 sm:$0xff]  }
 0x225   :  { %1841 = vmatpush1.bf16.msra.mxu0 %v4092_v55  ;;  %2290 = vmatpush1.bf16.msra.mxu1 %v4119_v40  ;;  %v4187_v55 = vld [vmem:[%s5627_s5 + $0x28] sm:$0xff]   ;;  %v4188_v40 = vld [vmem:[%s5627_s5 + $0x70] sm:$0xff]  }
 0x226   :  { %1842 = vmatprep.subr.bf16.mxu0 %v4097_v58  ;;  %2291 = vmatprep.subr.bf16.mxu1 %v4127_v50  ;;  %v4170_v58 = vld [vmem:[%s5625_s3 + $0x5b0] ss:$24 sps:$4 sm:$0xff]   ;;  %v4175_v50 = vld [vmem:[%s5625_s3 + $0x5e4] ss:$24 sps:$4 sm:$0xff]  }
 0x229   :  { %1843 = vmatpush1.bf16.msra.mxu0 %v4095_v59  ;;  %2292 = vmatpush1.bf16.msra.mxu1 %v4125_v56  ;;  %v4189_v59 = vld [vmem:[%s5627_s5 + $0x30] sm:$0xff]   ;;  %v4173_v56 = vld [vmem:[%s5625_s3 + $0x5e0] ss:$24 sps:$4 sm:$0xff]  }
 0x22a   :  { %1844 = vmatprep.subr.bf16.mxu0 %v4100_v61  ;;  %2293 = vmatprep.subr.bf16.mxu1 %v4133_v1  ;;  %v4190_v61 = vld [vmem:[%s5627_s5 + $0x78] sm:$0xff]  }
 0x22b   :  { %v4191_v1 = vld [vmem:[%s5627_s5 + $0x38] sm:$0xff]  }
 0x22d   :  { %1845 = vmatpush1.bf16.msra.mxu0 %v4098_v63  ;;  %2294 = vmatpush1.bf16.msra.mxu1 %v4131_v23  ;;  %v4192_v63 = vld [vmem:[%s5627_s5 + $0xc0] sm:$0xff]   ;;  %v2385_v23 = vlaneseq }
 0x22e   :  { %1846 = vmatprep.subr.bf16.mxu0 %v4103_v3  ;;  %2295 = vmatprep.subr.bf16.mxu1 %v4139_v22 }
 0x22f   :  { %v5488_v3 = vshrl.u32 %v2385_v23, 7 }
 0x231   :  { %1847 = vmatpush1.bf16.msra.mxu0 %v4101_v60  ;;  %2296 = vmatpush1.bf16.msra.mxu1 %v4137_v9  ;;  %v2403_v22 = vsub.s32 4, %v5488_v3  ;;  %v2383_v60 = vld [vmem:[%s5628_s4] sm:$0x3f]  ;;  %v2407_v34 = vsub.s32 5, %v5488_v3 }
 0x232   :  { %2242 = vmatprep.subr.bf16.mxu0 %v4106_v29  ;;  %2297 = vmatprep.subr.bf16.mxu1 %v4145_v8  ;;  %v2387_v29 = vsub.s32 0, %v5488_v3  ;;  %v2395_v8 = vsub.s32 2, %v5488_v3 }
 0x233   :  { %v5494_v9 = vrot.slane %v2383_v60, %v2403_v22 }
 0x234   :  { %3250 = vmatmul.mubr.msk.bf16.vlgmr.msra.gmra.mrb[4].mxu0 %vm5218_vm5, %v4227_v48 }
 0x235   :  { %2243 = vmatpush1.bf16.msra.mxu0 %v4104_v12  ;;  %2298 = vmatpush1.bf16.msra.mxu1 %v4143_v54  ;;  %v2391_v12 = vsub.s32 1, %v5488_v3  ;;  %v2399_v54 = vsub.s32 3, %v5488_v3 }
 0x236   :  { %2244 = vmatprep.subr.bf16.mxu0 %v4112_v26  ;;  %2274 = vmatprep.mubr.bf16.mxu0 %v4226_v17  ;;  %v2388_v26 = vrot.slane %v2383_v60, %v2387_v29 }
 0x237   :  { %2299 = vmatprep.subr.bf16.mxu1 %v4151_v18  ;;  %v4194_v18 = vld [vmem:[%s5627_s5 + $0xc8] sm:$0xff]  }
 0x239   :  { %2245 = vmatpush1.bf16.msra.mxu0 %v4110_v46  ;;  %2300 = vmatpush1.bf16.msra.mxu1 %v4149_v37  ;;  %v4195_v37 = vld [vmem:[%s5627_s5 + $0x88] sm:$0xff]  }
 0x23a   :  { %2246 = vmatprep.subr.bf16.mxu0 %v4118_v27  ;;  %3758 = vmatprep.subr.bf16.mxu1 %v4176_v19  ;;  %v4197_v19 = vld [vmem:[%s5627_s5 + $0x90] sm:$0xff]  }
 0x23d   :  { %2247 = vmatpush1.bf16.msra.mxu0 %v4116_v30  ;;  %v2396_v30 = vrot.slane %v2383_v60, %v2395_v8 }
 0x23e   :  { %2248 = vmatprep.subr.bf16.mxu0 %v4124_v57 }
 0x241   :  { %2249 = vmatpush1.bf16.msra.mxu0 %v4122_v4  ;;  %v2392_v4 = vrot.slane %v2383_v60, %v2391_v12 }
 0x242   :  { %2250 = vmatprep.subr.bf16.mxu0 %v4130_v13 }
 0x245   :  { %2251 = vmatpush1.bf16.msra.mxu0 %v4128_v6  ;;  %v2400_v6 = vrot.slane %v2383_v60, %v2399_v54 }
 0x246   :  { %2252 = vmatprep.subr.bf16.mxu0 %v4136_v32 }
 0x249   :  { %2253 = vmatpush1.bf16.msra.mxu0 %v4134_v5 }
 0x24a   :  { %2254 = vmatprep.subr.bf16.mxu0 %v4142_v20 }
 0x24d   :  { %2255 = vmatpush1.bf16.msra.mxu0 %v4140_v51 }
 0x24e   :  { %2256 = vmatprep.subr.bf16.mxu0 %v4148_v14 }
 0x251   :  { %2257 = vmatpush1.bf16.msra.mxu0 %v4146_v53  ;;  %v4193_v53 = vld [vmem:[%s5627_s5 + $0x80] sm:$0xff]  }
 0x252   :  { %2328 = vmatprep.subr.bf16.mxu0 %v4154_v15  ;;  %v4196_v15 = vld [vmem:[%s5627_s5 + $0xd0] sm:$0xff]  }
 0x2ef   :  { %v1939_v41 = vpop.f32.mrb[16].mxu1 }
 0x2f0   :  { %v3846_v31 = vpop.f32.mrb[17].mxu1  ;;  %vm1946_vm1 = vcmp.gt.f32.partialorder %v1939_v41, %v4841_v21  ;;  %v4198_v41 = vld [vmem:[%s5627_s5 + $0xd8] sm:$0xff]  }
 0x2f1   :  { %v1942_v10 = vpop.f32.mrb[18].mxu1  ;;  %v4199_v31 = vld [vmem:[%s5627_s5 + $0x98] sm:$0xff]  }
 0x2f2   :  { %vm1947_vm2 = vcmp.gt.f32.partialorder %v1942_v10, %v4841_v21  ;;  %v3847_v52 = vpop.f32.mrb[19].mxu1  ;;  %v4155_v21 = vld [vmem:[%s5625_s3 + $0x4c0] ss:$24 sps:$4 sm:$0xff]  }
 0x2f3   :  { %vm5390_vm6 = vmpackc.low %vm1947_vm2, %vm1946_vm1  ;;  %v4200_v10 = vld [vmem:[%s5627_s5 + $0xe0] sm:$0xff]   ;;  %v4202_v52 = vld [vmem:[%s5627_s5 + $0xe8] sm:$0xff]  }
 0x2f4   :  { %3353 = vmatmul.mubr.msk.bf16.vlgmr.msra.gmra.mrb[0].mxu0 %vm5390_vm6, %v4227_v48  ;;  %3355 = vmatmul.mubr.msk.bf16.vlgmr.msra.gmra.mrb[8].mxu1 %vm5390_vm6, %v4227_v48 }
 0x2f5   :  { %2329 = vmatpush1.bf16.msra.mxu0 %v4152_v44  ;;  %2360 = vmatprep.mubr.bf16.mxu0 %v4226_v17  ;;  %v4158_v17 = vld [vmem:[%s5625_s3 + $0x4f0] ss:$24 sps:$4 sm:$0xff]   ;;  %v4201_v44 = vld [vmem:[%s5627_s5 + $0xa0] sm:$0xff]  }
 0x2f6   :  { %2330 = vmatprep.subr.bf16.mxu0 %v4157_v24  ;;  %3759 = vmatpush3.bf16.msra.mxu1 %v4177_v33  ;;  %v4203_v24 = vld [vmem:[%s5627_s5 + $0xa8] sm:$0xff]   ;;  %v4204_v33 = vld [vmem:[%s5627_s5 + $0xf0] sm:$0xff]  }
 0x2f7   :  { %3760 = vmatprep.subr.bf16.mxu1 %v4178_v36  ;;  %v4205_v36 = vld [vmem:[%s5627_s5 + $0xb0] sm:$0xff]  }
 0x2f9   :  { %2331 = vmatpush1.bf16.msra.mxu0 %v4155_v21  ;;  %v4206_v21 = vld [vmem:[%s5627_s5 + $0xf8] sm:$0xff]  }
 0x2fa   :  { %2332 = vmatprep.subr.bf16.mxu0 %v4160_v35  ;;  %3761 = vmatpush3.bf16.msra.mxu1 %v4179_v11  ;;  %v2408_v11 = vrot.slane %v2383_v60, %v2407_v34  ;;  %v3370_v60 = vld [vmem:[%s5629_s6] ss:$0 sm:$0xff] }
 0x2fb   :  { %3762 = vmatprep.subr.bf16.mxu1 %v4180_v28 }
 0x2fd   :  { %2333 = vmatpush1.bf16.msra.mxu0 %v4158_v17  ;;  %v4207_v17 = vld [vmem:[%s5627_s5 + $0xb8] sm:$0xff]  }
 0x2fe   :  { %2334 = vmatprep.subr.bf16.mxu0 %v4163_v7  ;;  %3763 = vmatpush3.bf16.msra.mxu1 %v4181_v0  ;;  %v4208_v0 = vld [vmem:[%s5627_s5 + $0x140] sm:$0xff]  }
 0x2ff   :  { %3764 = vmatprep.subr.bf16.mxu1 %v4182_v38 }
 0x301   :  { %2335 = vmatpush1.bf16.msra.mxu0 %v4161_v39 }
 0x302   :  { %2336 = vmatprep.subr.bf16.mxu0 %v4166_v25  ;;  %3765 = vmatpush3.bf16.msra.mxu1 %v4183_v2  ;;  %v4209_v25 = vld [vmem:[%s5627_s5 + $0x100] sm:$0xff]   ;;  %v4210_v2 = vld [vmem:[%s5627_s5 + $0x148] sm:$0xff]  }
 0x303   :  { %3766 = vmatprep.subr.bf16.mxu1 %v4184_v42  ;;  %v4211_v42 = vld [vmem:[%s5627_s5 + $0x108] sm:$0xff]  }
 0x305   :  { %2337 = vmatpush1.bf16.msra.mxu0 %v4164_v43  ;;  %v4212_v43 = vld [vmem:[%s5627_s5 + $0x150] sm:$0xff]  }
 0x306   :  { %2338 = vmatprep.subr.bf16.mxu0 %v4169_v62  ;;  %3767 = vmatpush3.bf16.msra.mxu1 %v4185_v47  ;;  %v4213_v62 = vld [vmem:[%s5627_s5 + $0x110] sm:$0xff]   ;;  %v4214_v47 = vld [vmem:[%s5627_s5 + $0x158] sm:$0xff]  }
 0x307   :  { %3768 = vmatprep.subr.bf16.mxu1 %v4186_v45  ;;  %v4215_v45 = vld [vmem:[%s5627_s5 + $0x118] sm:$0xff]  }
 0x309   :  { %2339 = vmatpush1.bf16.msra.mxu0 %v4167_v16  ;;  %v4216_v16 = vld [vmem:[%s5627_s5 + $0x160] sm:$0xff]  }
 0x30a   :  { %2340 = vmatprep.subr.bf16.mxu0 %v4172_v49  ;;  %3769 = vmatpush3.bf16.msra.mxu1 %v4187_v55  ;;  %v4217_v49 = vld [vmem:[%s5627_s5 + $0x120] sm:$0xff]   ;;  %v4218_v55 = vld [vmem:[%s5627_s5 + $0x168] sm:$0xff]  }
 0x30b   :  { %3770 = vmatprep.subr.bf16.mxu1 %v4188_v40  ;;  %v4219_v40 = vld [vmem:[%s5627_s5 + $0x128] sm:$0xff]  }
 0x30d   :  { %2341 = vmatpush1.bf16.msra.mxu0 %v4170_v58  ;;  %v4220_v58 = vld [vmem:[%s5627_s5 + $0x170] sm:$0xff]  }
 0x30e   :  { %2342 = vmatprep.subr.bf16.mxu0 %v4175_v50  ;;  %3771 = vmatpush3.bf16.msra.mxu1 %v4189_v59  ;;  %v4221_v50 = vld [vmem:[%s5627_s5 + $0x130] sm:$0xff]   ;;  %v4222_v59 = vld [vmem:[%s5627_s5 + $0x178] sm:$0xff]  }
 0x30f   :  { %3772 = vmatprep.subr.bf16.mxu1 %v4190_v61 }
 0x311   :  { %2343 = vmatpush1.bf16.msra.mxu0 %v4173_v56  ;;  %v4223_v56 = vld [vmem:[%s5627_s5 + $0x138] sm:$0xff]  }
 0x312   :  { %3773 = vmatpush3.bf16.msra.mxu1 %v4191_v1 }
 0x313   :  { %3780 = vmatprep.subr.bf16.mxu1 %v4192_v63 }
 0x314   :  { %3357 = vmatmul.mubr.msk.bf16.vlgmr.msra.gmra.mrb[4].mxu0 %vm5390_vm6, %v4227_v48 }
 0x3c7   :  { %v2276_v46 = vpop.f32.mrb[0].mxu0  ;;  %v2319_v27 = vpop.f32.mrb[8].mxu1 }
 0x3c8   :  { %v2278_v57 = vpop.f32.mrb[1].mxu0  ;;  %v2321_v13 = vpop.f32.mrb[9].mxu1  ;;  %vm2415_vm7 = vcmp.gt.f32.partialorder %v2276_v46, %v2388_v26  ;;  %vm2417_vm10 = vcmp.gt.f32.partialorder %v2319_v27, %v2396_v30 }
 0x3c9   :  { %v2280_v32 = vpop.f32.mrb[2].mxu0  ;;  %v2323_v5 = vpop.f32.mrb[10].mxu1  ;;  %vm2416_vm14 = vcmp.gt.f32.partialorder %v2278_v57, %v2392_v4  ;;  %vm2418_vm0 = vcmp.gt.f32.partialorder %v2321_v13, %v2400_v6 }
 0x3ca   :  { %vm2421_vm8 = vcmp.gt.f32.partialorder %v2280_v32, %v2388_v26  ;;  %vm2423_vm9 = vcmp.gt.f32.partialorder %v2323_v5, %v2396_v30  ;;  %v2282_v20 = vpop.f32.mrb[3].mxu0  ;;  %v2325_v51 = vpop.f32.mrb[11].mxu1 }
 0x3cb   :  { %vm3421_vm11 = vmpackc.low %vm2421_vm8, %vm2415_vm7  ;;  %vm2422_vm12 = vcmp.gt.f32.partialorder %v2282_v20, %v2392_v4  ;;  %vm2424_vm13 = vcmp.gt.f32.partialorder %v2325_v51, %v2400_v6 }
 0x3cc   :  { %vm5500_vm15 = vmpackc.low %vm2423_vm9, %vm2417_vm10 }
 0x3cd   :  { %vm3419_vm3 = vmpackc.low %vm2422_vm12, %vm2416_vm14 }
 0x3ce   :  { %vm3423_vm4 = vmpackc.low %vm2424_vm13, %vm2418_vm0  ;;  %3420 = vmatprep.mubr.msk.bf16.mxu1 %vm3419_vm3, %v4227_v48 }
 0x3cf   :  { %3422 = vmatmul.mubr.msk.bf16.vlgmr.msra.gmra.mrb[20].mxu1 %vm3421_vm11, %v4227_v48 }
 0x3d0   :  { %3781 = vmatpush3.bf16.msra.mxu1 %v4193_v53  ;;  %3424 = vmatprep.mubr.msk.bf16.mxu1 %vm3423_vm4, %v4227_v48 }
 0x3d1   :  { %3782 = vmatprep.subr.bf16.mxu1 %v4194_v18 }
 0x3d4   :  { %3783 = vmatpush3.bf16.msra.mxu1 %v4195_v37 }
 0x3d5   :  { %3784 = vmatprep.subr.bf16.mxu1 %v4196_v15 }
 0x3d8   :  { %3785 = vmatpush3.bf16.msra.mxu1 %v4197_v19 }
 0x3d9   :  { %3786 = vmatprep.subr.bf16.mxu1 %v4198_v41 }
 0x3dc   :  { %3787 = vmatpush3.bf16.msra.mxu1 %v4199_v31 }
 0x3dd   :  { %3788 = vmatprep.subr.bf16.mxu1 %v4200_v10 }
 0x3e0   :  { %3789 = vmatpush3.bf16.msra.mxu1 %v4201_v44 }
 0x3e1   :  { %3790 = vmatprep.subr.bf16.mxu1 %v4202_v52 }
 0x3e4   :  { %3791 = vmatpush3.bf16.msra.mxu1 %v4203_v24 }
 0x3e5   :  { %3792 = vmatprep.subr.bf16.mxu1 %v4204_v33 }
 0x3e7   :  { %v2362_v35 = vpop.f32.mrb[4].mxu0 }
 0x3e8   :  { %vm2419_vm5 = vcmp.gt.f32.partialorder %v2362_v35, %v5494_v9  ;;  %3793 = vmatpush3.bf16.msra.mxu1 %v4205_v36  ;;  %v2364_v28 = vpop.f32.mrb[5].mxu0 }
 0x3e9   :  { %v2366_v7 = vpop.f32.mrb[6].mxu0  ;;  %3794 = vmatprep.subr.bf16.mxu1 %v4206_v21  ;;  %vm2420_vm2 = vcmp.gt.f32.partialorder %v2364_v28, %v2408_v11 }
 0x3ea   :  { %vm2425_vm1 = vcmp.gt.f32.partialorder %v2366_v7, %v5494_v9  ;;  %v2368_v38 = vpop.f32.mrb[7].mxu0 }
 0x3eb   :  { %vm5558_vm6 = vmpackc.low %vm2425_vm1, %vm2419_vm5  ;;  %vm2426_vm7 = vcmp.gt.f32.partialorder %v2368_v38, %v2408_v11 }
 0x3ec   :  { %vm3427_vm8 = vmpackc.low %vm2426_vm7, %vm2420_vm2  ;;  %3795 = vmatpush3.bf16.msra.mxu1 %v4207_v17 }
 0x3ed   :  { %3802 = vmatprep.subr.bf16.mxu1 %v4208_v0 }
 0x3ef   :  { %3426 = vmatmul.mubr.msk.bf16.vlgmr.msra.gmra.mrb[24].mxu1 %vm5500_vm15, %v4227_v48 }
 0x3f0   :  { %3803 = vmatpush3.bf16.msra.mxu1 %v4209_v25  ;;  %3428 = vmatprep.mubr.msk.bf16.mxu1 %vm3427_vm8, %v4227_v48 }
 0x3f1   :  { %3804 = vmatprep.subr.bf16.mxu1 %v4210_v2 }
 0x3f4   :  { %3805 = vmatpush3.bf16.msra.mxu1 %v4211_v42 }
 0x3f5   :  { %3806 = vmatprep.subr.bf16.mxu1 %v4212_v43 }
 0x3f8   :  { %3807 = vmatpush3.bf16.msra.mxu1 %v4213_v62 }
 0x3f9   :  { %3808 = vmatprep.subr.bf16.mxu1 %v4214_v47 }
 0x3fc   :  { %3809 = vmatpush3.bf16.msra.mxu1 %v4215_v45 }
 0x3fd   :  { %3810 = vmatprep.subr.bf16.mxu1 %v4216_v16 }
 0x400   :  { %3811 = vmatpush3.bf16.msra.mxu1 %v4217_v49 }
 0x401   :  { %3812 = vmatprep.subr.bf16.mxu1 %v4218_v55 }
 0x404   :  { %3813 = vmatpush3.bf16.msra.mxu1 %v4219_v40 }
 0x405   :  { %3814 = vmatprep.subr.bf16.mxu1 %v4220_v58 }
 0x408   :  { %3815 = vmatpush3.bf16.msra.mxu1 %v4221_v50 }
 0x409   :  { %3816 = vmatprep.subr.bf16.mxu1 %v4222_v59 }
 0x40c   :  { %3817 = vmatpush3.bf16.msra.mxu1 %v4223_v56 }
 0x40f   :  { %3430 = vmatmul.mubr.msk.bf16.vlgmr.msra.gmra.mrb[28].mxu1 %vm5558_vm6, %v4227_v48 }
 0x4a2   :  { %v3774_v61 = vpop.f32.mrb[20].mxu1 }
 0x4a3   :  { %v3775_v1 = vpop.f32.mrb[21].mxu1 }
 0x4a4   :  { %v3776_v63 = vadd.f32 %v3775_v1, %v3774_v61  ;;  %v3777_v23 = vpop.f32.mrb[22].mxu1 }
 0x4a5   :  { %v3778_v3 = vpop.f32.mrb[23].mxu1 }
 0x4a6   :  { %v3779_v22 = vadd.f32 %v3778_v3, %v3777_v23  ;;  %v2883_v8 = vadd.f32 %v3776_v63, %v3370_v60 }
 0x4a8   :  { %v2886_v46 = vadd.f32 %v3779_v22, %v3370_v60 }
 0x4c2   :  { %v3796_v9 = vpop.f32.mrb[24].mxu1 }
 0x4c3   :  { %v3797_v29 = vpop.f32.mrb[25].mxu1 }
 0x4c4   :  { %v3798_v12 = vadd.f32 %v3797_v29, %v3796_v9  ;;  %v3799_v54 = vpop.f32.mrb[26].mxu1 }
 0x4c5   :  { %v3800_v26 = vpop.f32.mrb[27].mxu1 }
 0x4c6   :  { %v2924_v27 = vadd.f32 %v3798_v12, %v2883_v8  ;;  %v3801_v30 = vadd.f32 %v3800_v26, %v3799_v54 }
 0x4c8   :  { %v2927_v48 = vadd.f32 %v3801_v30, %v2886_v46 }
 0x4e2   :  { %v3818_v57 = vpop.f32.mrb[28].mxu1 }
 0x4e3   :  { %v3819_v4 = vpop.f32.mrb[29].mxu1 }
 0x4e4   :  { %v3820_v13 = vadd.f32 %v3819_v4, %v3818_v57  ;;  %v3821_v6 = vpop.f32.mrb[30].mxu1 }
 0x4e5   :  { %v3822_v32 = vpop.f32.mrb[31].mxu1 }
 0x4e6   :  { %v2965_v5 = vadd.f32 %v3820_v13, %v2924_v27  ;;  %v3823_v20 = vadd.f32 %v3822_v32, %v3821_v6 }
 0x4e8   :  { %2971 = vst [vmem:[%s5630_s7] sm:$0xff] %v2965_v5  ;;  %v2968_v51 = vadd.f32 %v3823_v20, %v2927_v48 }
 0x4ea   :  { %2972 = vst [vmem:[%s5630_s7 + $0x8] sm:$0xff] %v2968_v51 }

</bundles_post_ra>
